<compile_context>
chip_gen: v5e
topology: v5e:2x2
jax: 0.10.0
libtpu: 0.0.40
codegen_flags: <defaults>
</compile_context>

<pallas_src>
import functools

import jax
import jax.numpy as jnp
from jax.experimental import pallas as pl
from jax.experimental.pallas import tpu as pltpu


def _round_up(x, m):
    return (x + m - 1) // m * m


def _cdiv(a, b):
    return (a + b - 1) // b


def _fit_tile(dim, max_tile, granule):
    """Tile <= max_tile (granule-aligned) chosen so padding waste stays small."""
    cap = max(granule, _round_up(min(max_tile, dim), granule))
    n = _cdiv(dim, cap)
    return max(granule, _round_up(_cdiv(dim, n), granule))


def _spmm_kernel(adj_ref, emb_ref, out_ref, acc_ref, *, tk, resident, precision):
    """Grid: (i over row tiles, k over reduction tiles). D is never tiled.

    adj_ref : (tm, tk)        streamed adjacency tile
    emb_ref : (Kp, D)|(tk, D) resident full embeds, or streamed k-tile
    out_ref : (tm, D)         output tile (out dtype), written on last k
    acc_ref : (tm, D) f32     VMEM accumulator
    """
    k = pl.program_id(1)
    if resident:
        off = pl.multiple_of(k * tk, tk)
        rhs = emb_ref[pl.ds(off, tk), :]
    else:
        rhs = emb_ref[...]

    part = jnp.dot(
        adj_ref[...],
        rhs,
        preferred_element_type=jnp.float32,
        precision=precision,
    )

    @pl.when(k == 0)
    def _():
        acc_ref[...] = part

    @pl.when(k > 0)
    def _():
        acc_ref[...] += part

    @pl.when(k == pl.num_programs(1) - 1)
    def _():
        out_ref[...] = acc_ref[...].astype(out_ref.dtype)


def gcn_layer(adj, embeds, *, tm_max=512, tk_max=2048,
              compute_dtype=None,
              precision=jax.lax.Precision.HIGHEST):
    """out = adj @ embeds (torch.spmm semantics), tiled for the MXU."""
    M, K = adj.shape
    K2, D = embeds.shape
    assert K == K2, "adjacency inner dim must match embeds rows"
    out_dtype = embeds.dtype

    # Only cast when explicitly asked (callers should pre-cast adj once at
    # model init to avoid an extra full HBM pass per layer).
    if compute_dtype is not None:
        if adj.dtype != compute_dtype:
            adj = adj.astype(compute_dtype)
        if embeds.dtype != compute_dtype:
            embeds = embeds.astype(compute_dtype)
    abytes = jnp.dtype(adj.dtype).itemsize
    ebytes = jnp.dtype(embeds.dtype).itemsize
    obytes = jnp.dtype(out_dtype).itemsize

    # Generation-aware VMEM budget (leave headroom for compiler scratch).
    try:
        phys_vmem = int(pltpu.get_tpu_info().vmem_capacity_bytes)
    except Exception:
        phys_vmem = 64 * 1024 * 1024  # conservative (v7x per-TC)
    budget = max(16 * 1024 * 1024, phys_vmem - 8 * 1024 * 1024)

    def vmem_estimate(tm_, tk_, kp_, resident_):
        adj_buf = 2 * tm_ * tk_ * abytes                       # double-buffered stream
        emb_rows = kp_ if resident_ else tk_
        emb_buf = 2 * emb_rows * D * ebytes                    # count double buffer
        out_buf = 2 * tm_ * D * obytes
        acc_buf = tm_ * D * 4
        return adj_buf + emb_buf + out_buf + acc_buf

    # Tile derivation: minimize padding waste (granules cover packed dtypes too).
    tm = _fit_tile(M, tm_max, 32)
    tk = _fit_tile(K, tk_max, 128)
    Kp = _round_up(K, tk)

    resident = vmem_estimate(tm, tk, Kp, True) <= budget
    if not resident:
        # Streamed embeds: raise tm so the extra embeds traffic (~D/tm) stays small.
        tm = _fit_tile(M, max(tm_max, 512), 32)
    while vmem_estimate(tm, tk, Kp, resident) > budget and tk > 128:
        tk = max(128, _round_up(tk // 2, 128))
        Kp = _round_up(K, tk)
    while vmem_estimate(tm, tk, Kp, resident) > budget and tm > 32:
        tm = max(32, _round_up(tm // 2, 32))

    Mp = _round_up(M, tm)
    Kp = _round_up(K, tk)

    # Zero-pad only when shapes are not tile multiples (mathematically neutral).
    adj_c = adj
    emb_c = embeds
    if (Mp, Kp) != (M, K):
        adj_c = jnp.pad(adj_c, ((0, Mp - M), (0, Kp - K)))
    if Kp != K:
        emb_c = jnp.pad(emb_c, ((0, Kp - K), (0, 0)))

    grid = (Mp // tm, Kp // tk)

    if resident:
        emb_spec = pl.BlockSpec((Kp, D), lambda i, k: (0, 0))
        emb_bytes_accessed = Kp * D * ebytes
    else:
        emb_spec = pl.BlockSpec((tk, D), lambda i, k: (k, 0))
        emb_bytes_accessed = grid[0] * Kp * D * ebytes

    cost = pl.CostEstimate(
        flops=2 * Mp * Kp * D,
        transcendentals=0,
        bytes_accessed=Mp * Kp * abytes + emb_bytes_accessed + Mp * D * obytes,
    )

    est = vmem_estimate(tm, tk, Kp, resident)
    vmem_limit = int(min(budget, max(32 * 1024 * 1024, int(1.25 * est))))

    out = pl.pallas_call(
        functools.partial(_spmm_kernel, tk=tk, resident=resident,
                          precision=precision),
        out_shape=jax.ShapeDtypeStruct((Mp, D), out_dtype),
        grid_spec=pltpu.PrefetchScalarGridSpec(
            num_scalar_prefetch=0,
            grid=grid,
            in_specs=[
                # adj: streamed tile-by-tile, each tile read from HBM exactly once.
                pl.BlockSpec((tm, tk), lambda i, k: (i, k)),
                emb_spec,
            ],
            out_specs=pl.BlockSpec((tm, D), lambda i, k: (i, 0)),
            scratch_shapes=[pltpu.VMEM((tm, D), jnp.float32)],
        ),
        compiler_params=pltpu.CompilerParams(
            dimension_semantics=("parallel", "arbitrary"),
            vmem_limit_bytes=vmem_limit,
        ),
        cost_estimate=cost,
    )(adj_c, emb_c)

    if Mp != M:
        out = out[:M]
    return out


if __name__ == "__main__":
    key = jax.random.PRNGKey(0)
    k_adj, k_emb = jax.random.split(key)

    N_NODES = 256   # number of graph nodes (adjacency is N x N)
    HIDDEN = 128    # embedding dim

    # Deterministic synthetic sparse-ish adjacency (dense storage) and embeddings.
    raw = jax.random.uniform(k_adj, (N_NODES, N_NODES), dtype=jnp.float32)
    adj = jnp.where(raw > 0.9, raw, 0.0)  # ~10% nonzeros, like a sparse graph
    embeds = jax.random.normal(k_emb, (N_NODES, HIDDEN), dtype=jnp.float32)

    out = gcn_layer(adj, embeds)
    out = jax.block_until_ready(out)

    # Correctness check against plain JAX matmul (torch.spmm semantics),
    # both sides at full f32 precision.
    ref = jnp.dot(adj, embeds, precision=jax.lax.Precision.HIGHEST)
    assert out.shape == (N_NODES, HIDDEN)
    assert out.dtype == embeds.dtype
    assert jnp.allclose(out, ref, atol=1e-4, rtol=1e-4), (
        float(jnp.max(jnp.abs(out - ref)))
    )

    print("KERNEL_OK")
</pallas_src>

<mosaic_0001>
module attributes {stable_mosaic.version = 11 : i64} {
  func.func @_spmm_kernel(%arg0: i32, %arg1: i32, %arg2: memref<256x256xf32, #tpu.memory_space<vmem>>, %arg3: memref<256x128xf32, #tpu.memory_space<vmem>>, %arg4: memref<256x128xf32, #tpu.memory_space<vmem>>, %arg5: memref<256x128xf32, #tpu.memory_space<vmem>>) attributes {dimension_semantics = [#tpu.dimension_semantics<parallel>, #tpu.dimension_semantics<arbitrary>], iteration_bounds = array<i64: 1, 1>, scalar_prefetch = 0 : i64, scratch_operands = 1 : i64, tpu.core_type = #tpu.core_type<tc>, window_params = [{transform_indices = @transform_0, window_bounds = array<i64: 256, 256>}, {pipeline_mode = #tpu.pipeline_mode<synchronous>, transform_indices = @transform_1, window_bounds = array<i64: 256, 128>}, {transform_indices = @transform_2, window_bounds = array<i64: 256, 128>}]} {
    %c256_i32 = arith.constant 256 : i32
    %0 = arith.muli %arg1, %c256_i32 : i32
    %1 = tpu.assume_multiple %0, 256 : i32
    %2 = arith.index_cast %1 : i32 to index
    %c0 = arith.constant 0 : index
    %3 = vector.load %arg3[%2, %c0] : memref<256x128xf32, #tpu.memory_space<vmem>>, vector<256x128xf32>
    %c0_0 = arith.constant 0 : index
    %c0_1 = arith.constant 0 : index
    %4 = vector.load %arg2[%c0_0, %c0_1] : memref<256x256xf32, #tpu.memory_space<vmem>>, vector<256x256xf32>
    %cst = arith.constant dense<0.000000e+00> : vector<256x128xf32>
    %5 = tpu.matmul %4, %3, %cst {dimension_numbers = #tpu.dot_dimension_numbers<[1], [0], [0], [1], [0, 0, 1, 1], [], []>, precision = #tpu.contract_precision<fp32>} : vector<256x256xf32>, vector<256x128xf32>, vector<256x128xf32> -> vector<256x128xf32>
    %c0_i32 = arith.constant 0 : i32
    %6 = arith.cmpi eq, %arg1, %c0_i32 : i32
    %7 = arith.extui %6 : i1 to i32
    %c0_i32_2 = arith.constant 0 : i32
    %8 = arith.cmpi ne, %7, %c0_i32_2 : i32
    scf.if %8 {
      %c0_7 = arith.constant 0 : index
      %c0_8 = arith.constant 0 : index
      %15 = vector.load %arg5[%c0_7, %c0_8] : memref<256x128xf32, #tpu.memory_space<vmem>>, vector<256x128xf32>
      tpu.vector_store %arg5[%c0_7, %c0_8], %5 {strides = array<i32>} : memref<256x128xf32, #tpu.memory_space<vmem>>, vector<256x128xf32>,
    } else {
    }
    %c0_i32_3 = arith.constant 0 : i32
    %9 = arith.cmpi sgt, %arg1, %c0_i32_3 : i32
    %10 = arith.extui %9 : i1 to i32
    %c0_i32_4 = arith.constant 0 : i32
    %11 = arith.cmpi ne, %10, %c0_i32_4 : i32
    scf.if %11 {
      %c0_7 = arith.constant 0 : index
      %c0_8 = arith.constant 0 : index
      %15 = vector.load %arg5[%c0_7, %c0_8] : memref<256x128xf32, #tpu.memory_space<vmem>>, vector<256x128xf32>
      %16 = arith.addf %15, %5 : vector<256x128xf32>
      %c0_9 = arith.constant 0 : index
      %c0_10 = arith.constant 0 : index
      %17 = vector.load %arg5[%c0_9, %c0_10] : memref<256x128xf32, #tpu.memory_space<vmem>>, vector<256x128xf32>
      tpu.vector_store %arg5[%c0_9, %c0_10], %16 {strides = array<i32>} : memref<256x128xf32, #tpu.memory_space<vmem>>, vector<256x128xf32>,
    } else {
    }
    %c0_i32_5 = arith.constant 0 : i32
    %12 = arith.cmpi eq, %arg1, %c0_i32_5 : i32
    %13 = arith.extui %12 : i1 to i32
    %c0_i32_6 = arith.constant 0 : i32
    %14 = arith.cmpi ne, %13, %c0_i32_6 : i32
    scf.if %14 {
      %c0_7 = arith.constant 0 : index
      %c0_8 = arith.constant 0 : index
      %15 = vector.load %arg5[%c0_7, %c0_8] : memref<256x128xf32, #tpu.memory_space<vmem>>, vector<256x128xf32>
      %c0_9 = arith.constant 0 : index
      %c0_10 = arith.constant 0 : index
      %16 = vector.load %arg4[%c0_9, %c0_10] : memref<256x128xf32, #tpu.memory_space<vmem>>, vector<256x128xf32>
      tpu.vector_store %arg4[%c0_9, %c0_10], %15 {strides = array<i32>} : memref<256x128xf32, #tpu.memory_space<vmem>>, vector<256x128xf32>,
    } else {
    }
    return
  }
  func.func @transform_0(%arg0: i32, %arg1: i32) -> (i32, i32) {
    %c0_i32 = arith.constant 0 : i32
    return %arg0, %arg1 : i32, i32
  }
  func.func @transform_1(%arg0: i32, %arg1: i32) -> (i32, i32) {
    %c0_i32 = arith.constant 0 : i32
    %c0_i32_0 = arith.constant 0 : i32
    %c0_i32_1 = arith.constant 0 : i32
    return %c0_i32, %c0_i32_0 : i32, i32
  }
  func.func @transform_2(%arg0: i32, %arg1: i32) -> (i32, i32) {
    %c0_i32 = arith.constant 0 : i32
    %c0_i32_0 = arith.constant 0 : i32
    return %arg0, %c0_i32 : i32, i32
  }
}

</mosaic_0001>

<bundles_post_ra>
// kernel: tpu_custom_call.1
= control target key start
LH: loop header
LB: loop body
LE: loop exit
PB: predicated region body
PF: predicated region fallthrough
CT: control target
= control target key end

     0   :  { %7 = vsyncpa [#allocation4], 0  ;;  %s4445_s0 = inlined_call_operand.hbm [shape: f32[256,256], index: 0, kind: input, shape index: {}]   ;;  %s4446_s1 = inlined_call_operand.hbm [shape: f32[256,128], index: 1, kind: input, shape index: {}]   ;;  %s4447_s2 = inlined_call_operand.hbm [shape: f32[256,128], index: 2, kind: output, shape index: {}]  }
   0x1   :  { %8 = vsyncpa [#allocation7], 0 }
   0x2   :  { %9 = vsyncpa [#allocation5], 0  ;;  %s14_s11 = sshll.u32 %s4445_s0, 4  ;;  %s3054_s12 = smov [#allocation3]   ;;  %s15_s11 = int_to_ptr.hbm [resolvable:$true] %s14_s11 }
   0x3   :  { %s16_s13 = sshll.u32 %s3054_s12, 4  ;;  %s27_s16 = sshll.u32 %s4446_s1, 4  ;;  %s17_s13 = int_to_ptr.vmem [resolvable:$true] %s16_s13  ;;  %s28_s16 = int_to_ptr.hbm [resolvable:$true] %s27_s16 }
   0x4   :  { %s3055_s17 = smov 256   ;;  %s3056_s18 = smov 16  }
   0x5   :  { %22 = dma.hbm_to_vmem [thread:$0]  %s15_s11, 8192, %s17_s13, [#allocation4], %s3055_s17, %s3055_s17, %s3056_s18  }
   0x6   :  { %s3057_s19 = smov [#allocation6]   ;;  %s3058_s21 = smov 128  }
   0x7   :  { %s29_s20 = sshll.u32 %s3057_s19, 4  ;;  %s3059_s22 = smov 8   ;;  %s30_s20 = int_to_ptr.vmem [resolvable:$true] %s29_s20 }
   0x8   :  { %35 = dma.hbm_to_vmem [thread:$0]  %s28_s16, 4096, %s30_s20, [#allocation7], %s3058_s21, %s3058_s21, %s3059_s22  }
   0x9   :  { %3048 = dma.done.wait [#allocation4], 8192  }
   0xa   :  { %3049 = vsyncadd [#allocation4], 4294959104 }
   0xb   :  { %3050 = dma.done.wait [#allocation7], 4096  }
   0xc   :  { %3051 = vsyncadd [#allocation7], 4294963200  ;;  %v61_v0 = vld [vmem:[#allocation6 + $0x78] sm:$0xff]  ;;  %v60_v1 = vld [vmem:[#allocation6 + $0x70] sm:$0xff]  ;;  %s3060_s0 = smov [#allocation8]   ;;  %s2955_s25 = sshll.u32 %s4447_s2, 4  ;;  %s2956_s25 = int_to_ptr.hbm [resolvable:$true] %s2955_s25 }
   0xd   :  { %v59_v2 = vld [vmem:[#allocation6 + $0x68] sm:$0xff]  ;;  %v3085_v3 = vand.u32 4294901760, %v61_v0  ;;  %v3087_v4 = vand.u32 4294901760, %v60_v1  ;;  %v58_v6 = vld [vmem:[#allocation6 + $0x60] sm:$0xff]  ;;  %v57_v7 = vld [vmem:[#allocation6 + $0x58] sm:$0xff]  ;;  %s2953_s1 = sshll.u32 %s3060_s0, 4  ;;  %s2954_s1 = int_to_ptr.vmem [resolvable:$true] %s2953_s1 }
   0xe   :  { %v3089_v5 = vand.u32 4294901760, %v59_v2  ;;  %v56_v8 = vld [vmem:[#allocation6 + $0x50] sm:$0xff]  ;;  %v3091_v9 = vand.u32 4294901760, %v58_v6  ;;  %v3093_v10 = vand.u32 4294901760, %v57_v7  ;;  %v55_v12 = vld [vmem:[#allocation6 + $0x48] sm:$0xff]  ;;  %v54_v13 = vld [vmem:[#allocation6 + $0x40] sm:$0xff] }
   0xf   :  { %v3095_v11 = vand.u32 4294901760, %v56_v8  ;;  %143 = vmatpush.msra.mxu0 %v3085_v3  ;;  %v3099_v14 = vsub.f32 %v61_v0, %v3085_v3  ;;  %v3102_v15 = vsub.f32 %v60_v1, %v3087_v4  ;;  %866 = vmatpush.msra.mxu3 %v3085_v3  ;;  %v3108_v17 = vand.u32 4294901760, %v55_v12  ;;  %v53_v18 = vld [vmem:[#allocation6 + $0x38] sm:$0xff]  ;;  %v52_v26 = vld [vmem:[#allocation6 + $0x30] sm:$0xff]  ;;  %v51_v34 = vld [vmem:[#allocation6 + $0x28] sm:$0xff] }
  0x10   :  { %v3106_v16 = vsub.f32 %v59_v2, %v3089_v5  ;;  %v3111_v19 = vsub.f32 %v58_v6, %v3091_v9  ;;  %v3114_v20 = vsub.f32 %v57_v7, %v3093_v10  ;;  %v3124_v25 = vand.u32 4294901760, %v54_v13  ;;  %v50_v44 = vld [vmem:[#allocation6 + $0x20] sm:$0xff]  ;;  %v49_v49 = vld [vmem:[#allocation6 + $0x18] sm:$0xff]  ;;  %v48_v56 = vld [vmem:[#allocation6 + $0x10] sm:$0xff] }
  0x11   :  { %v3117_v21 = vsub.f32 %v56_v8, %v3095_v11  ;;  %145 = vmatpush.msra.mxu0 %v3087_v4  ;;  %658 = vmatpush.msra.mxu2 %v3099_v14  ;;  %v433_v22 = vand.u32 4294901760, %v3099_v14  ;;  %v439_v23 = vand.u32 4294901760, %v3102_v15  ;;  %v3128_v28 = vand.u32 4294901760, %v53_v18  ;;  %v78_v57 = vld [vmem:[#allocation3] sm:$0xff]  ;;  %v47_v62 = vld [vmem:[#allocation6 + $0x8] sm:$0xff]  ;;  %v77_v63 = vld [vmem:[#allocation6 + $0xf8] sm:$0xff] }
  0x12   :  { %v445_v24 = vand.u32 4294901760, %v3106_v16  ;;  %868 = vmatpush.msra.mxu3 %v3087_v4  ;;  %v451_v27 = vand.u32 4294901760, %v3111_v19  ;;  %v3131_v29 = vsub.f32 %v55_v12, %v3108_v17  ;;  %v457_v33 = vand.u32 4294901760, %v3114_v20 }
  0x13   :  { %147 = vmatpush.msra.mxu0 %v3089_v5  ;;  %661 = vmatpush.msra.mxu2 %v3102_v15  ;;  %v434_v30 = vsub.f32 %v3099_v14, %v433_v22  ;;  %v440_v31 = vsub.f32 %v3102_v15, %v439_v23  ;;  %v3146_v35 = vand.u32 4294901760, %v52_v26  ;;  %v463_v36 = vand.u32 4294901760, %v3117_v21 }
  0x14   :  { %v446_v32 = vsub.f32 %v3106_v16, %v445_v24  ;;  %870 = vmatpush.msra.mxu3 %v3089_v5  ;;  %v452_v39 = vsub.f32 %v3111_v19, %v451_v27  ;;  %v3155_v40 = vsub.f32 %v54_v13, %v3124_v25  ;;  %v3158_v41 = vand.u32 4294901760, %v51_v34  ;;  %v46_v13 = vld [vmem:[#allocation6] sm:$0xff] }
  0x15   :  { %149 = vmatpush.msra.mxu0 %v3091_v9  ;;  %v435_v37 = vand.u32 4294901760, %v434_v30  ;;  %664 = vmatpush.msra.mxu2 %v3106_v16  ;;  %v441_v38 = vand.u32 4294901760, %v440_v31  ;;  %v4457_v42 = vand.u32 4294901760, %v3131_v29  ;;  %v3162_v43 = vsub.f32 %v53_v18, %v3128_v28 }
  0x16   :  { %872 = vmatpush.msra.mxu3 %v3091_v9  ;;  %v447_v45 = vand.u32 4294901760, %v446_v32  ;;  %v458_v46 = vsub.f32 %v3114_v20, %v457_v33  ;;  %v464_v47 = vsub.f32 %v3117_v21, %v463_v36  ;;  %v3174_v48 = vsub.f32 %v52_v26, %v3146_v35  ;;  %v80_v32 = vld [vmem:[#allocation3 + $0x10] sm:$0xff] }
  0x17   :  { %151 = vmatpush.msra.mxu0 %v3093_v10  ;;  %436 = vmatpush.msra.mxu1 %v435_v37  ;;  %v453_v50 = vand.u32 4294901760, %v452_v39  ;;  %v3177_v51 = vand.u32 4294901760, %v50_v44  ;;  %v4453_v52 = vand.u32 4294901760, %v3155_v40  ;;  %v470_v53 = vsub.f32 %v3131_v29, %v4457_v42 }
  0x18   :  { %667 = vmatpush.msra.mxu2 %v3111_v19  ;;  %874 = vmatpush.msra.mxu3 %v3093_v10  ;;  %v4452_v54 = vand.u32 4294901760, %v3162_v43  ;;  %v3187_v55 = vsub.f32 %v51_v34, %v3158_v41  ;;  %v459_v58 = vand.u32 4294901760, %v458_v46  ;;  %v3190_v59 = vand.u32 4294901760, %v49_v49 }
  0x19   :  { %153 = vmatpush.msra.mxu0 %v3095_v11  ;;  %442 = vmatpush.msra.mxu1 %v441_v38  ;;  %v465_v60 = vand.u32 4294901760, %v464_v47  ;;  %v4451_v61 = vand.u32 4294901760, %v3174_v48  ;;  %v476_v0 = vsub.f32 %v3155_v40, %v4453_v52  ;;  %v3199_v1 = vand.u32 4294901760, %v48_v56 }
  0x1a   :  { %670 = vmatpush.msra.mxu2 %v3114_v20  ;;  %876 = vmatpush.msra.mxu3 %v3095_v11  ;;  %v3202_v2 = vsub.f32 %v50_v44, %v3177_v51  ;;  %v3204_v6 = vand.u32 4294901760, %v78_v57  ;;  %v471_v7 = vand.u32 4294901760, %v470_v53  ;;  %v482_v8 = vsub.f32 %v3162_v43, %v4452_v54 }
  0x1b   :  { %155 = vmatpush.msra.mxu0 %v3108_v17  ;;  %448 = vmatpush.msra.mxu1 %v447_v45  ;;  %v4449_v12 = vand.u32 4294901760, %v3187_v55  ;;  %v3213_v18 = vand.u32 4294901760, %v47_v62  ;;  %v3216_v26 = vsub.f32 %v49_v49, %v3190_v59  ;;  %v3221_v31 = vand.u32 4294901760, %v77_v63  ;;  %v76_v45 = vld [vmem:[#allocation6 + $0xf0] sm:$0xff] }
  0x1c   :  { %673 = vmatpush.msra.mxu2 %v3117_v21  ;;  %878 = vmatpush.msra.mxu3 %v3108_v17  ;;  %v3219_v30 = vsub.f32 %v78_v57, %v3204_v6  ;;  %v488_v34 = vsub.f32 %v3174_v48, %v4451_v61  ;;  %v477_v37 = vand.u32 4294901760, %v476_v0  ;;  %v3229_v38 = vand.u32 4294901760, %v46_v13 }
  0x1d   :  { %157 = vmatpush.msra.mxu0 %v3124_v25  ;;  %454 = vmatpush.msra.mxu1 %v453_v50  ;;  %v4448_v39 = vand.u32 4294901760, %v3202_v2  ;;  %v3233_v44 = vsub.f32 %v48_v56, %v3199_v1  ;;  %v483_v46 = vand.u32 4294901760, %v482_v8  ;;  %v494_v47 = vsub.f32 %v3187_v55, %v4449_v12  ;;  %v82_v12 = vld [vmem:[#allocation3 + $0x20] sm:$0xff] }
  0x1e   :  { %676 = vmatpush.msra.mxu2 %v3131_v29  ;;  %880 = vmatpush.msra.mxu3 %v3124_v25  ;;  %v176_v49 = vand.u32 4294901760, %v3219_v30  ;;  %v3241_v50 = vand.u32 4294901760, %v80_v32  ;;  %v4450_v53 = vand.u32 4294901760, %v3216_v26  ;;  %v3246_v56 = vsub.f32 %v47_v62, %v3213_v18 }
  0x1f   :  { %159 = vmatpush.msra.mxu0 %v3128_v28  ;;  %460 = vmatpush.msra.mxu1 %v459_v58  ;;  %v3249_v57 = vsub.f32 %v77_v63, %v3221_v31  ;;  %v3251_v58 = vand.u32 4294901760, %v76_v45  ;;  %v500_v0 = vsub.f32 %v3202_v2, %v4448_v39  ;;  %v4454_v62 = vand.u32 4294901760, %v3233_v44 }
  0x20   :  { %679 = vmatpush.msra.mxu2 %v3155_v40  ;;  %882 = vmatpush.msra.mxu3 %v3128_v28  ;;  %v177_v8 = vsub.f32 %v3219_v30, %v176_v49  ;;  %v3289_v52 = vand.u32 4294901760, %v82_v12  ;;  %v4611_v21 = vand.u32 4294901760, %v3155_v40 }
  0x21   :  { %161 = vmatpush.msra.mxu0 %v3146_v35  ;;  %466 = vmatpush.msra.mxu1 %v465_v60  ;;  %v489_v60 = vand.u32 4294901760, %v488_v34  ;;  %v3264_v63 = vsub.f32 %v76_v45, %v3251_v58  ;;  %v3270_v34 = vsub.f32 %v80_v32, %v3241_v50  ;;  %v4456_v45 = vand.u32 4294901760, %v3246_v56 }
  0x22   :  { %682 = vmatpush.msra.mxu2 %v3162_v43  ;;  %884 = vmatpush.msra.mxu3 %v3146_v35  ;;  %v4455_v39 = vand.u32 4294901760, %v3249_v57  ;;  %v501_v32 = vand.u32 4294901760, %v500_v0  ;;  %v178_v61 = vand.u32 4294901760, %v177_v8 }
  0x23   :  { %163 = vmatpush.msra.mxu0 %v3158_v41  ;;  %472 = vmatpush.msra.mxu1 %v471_v7  ;;  %v3261_v7 = vsub.f32 %v46_v13, %v3229_v38  ;;  %v506_v13 = vsub.f32 %v3216_v26, %v4450_v53  ;;  %v4458_v53 = vand.u32 4294901760, %v3264_v63  ;;  %v184_v54 = vand.u32 4294901760, %v3270_v34 }
  0x24   :  { %685 = vmatpush.msra.mxu2 %v3174_v48  ;;  %886 = vmatpush.msra.mxu3 %v3158_v41  ;;  %v518_v0 = vsub.f32 %v3246_v56, %v4456_v45  ;;  %v191_v45 = vsub.f32 %v82_v12, %v3289_v52 }
  0x25   :  { %165 = vmatpush.msra.mxu0 %v3177_v51  ;;  %478 = vmatpush.msra.mxu1 %v477_v37  ;;  %v495_v37 = vand.u32 4294901760, %v494_v47  ;;  %v4459_v47 = vand.u32 4294901760, %v3261_v7 }
  0x26   :  { %688 = vmatpush.msra.mxu2 %v3187_v55  ;;  %888 = vmatpush.msra.mxu3 %v3177_v51  ;;  %v519_v42 = vand.u32 4294901760, %v518_v0 }
  0x27   :  { %167 = vmatpush.msra.mxu0 %v3190_v59  ;;  %484 = vmatpush.msra.mxu1 %v483_v46  ;;  %v512_v46 = vsub.f32 %v3233_v44, %v4454_v62  ;;  %v1736_v62 = vsub.f32 %v3249_v57, %v4455_v39  ;;  %v185_v39 = vsub.f32 %v3270_v34, %v184_v54 }
  0x28   :  { %691 = vmatpush.msra.mxu2 %v3202_v2  ;;  %890 = vmatpush.msra.mxu3 %v3190_v59 }
  0x29   :  { %169 = vmatpush.msra.mxu0 %v3199_v1  ;;  %490 = vmatpush.msra.mxu1 %v489_v60  ;;  %v507_v60 = vand.u32 4294901760, %v506_v13  ;;  %v513_v8 = vand.u32 4294901760, %v512_v46  ;;  %v1742_v13 = vsub.f32 %v3264_v63, %v4458_v53  ;;  %v84_v46 = vld [vmem:[#allocation3 + $0x30] sm:$0xff]  ;;  %v186_v12 = vand.u32 4294901760, %v185_v39 }
  0x2a   :  { %694 = vmatpush.msra.mxu2 %v3216_v26  ;;  %892 = vmatpush.msra.mxu3 %v3199_v1  ;;  %v3316_v0 = vand.u32 4294901760, %v84_v46 }
  0x2b   :  { %171 = vmatpush.msra.mxu0 %v3213_v18  ;;  %496 = vmatpush.msra.mxu1 %v495_v37  ;;  %v524_v37 = vsub.f32 %v3261_v7, %v4459_v47  ;;  %v75_v47 = vld [vmem:[#allocation6 + $0xe8] sm:$0xff] }
  0x2c   :  { %697 = vmatpush.msra.mxu2 %v3233_v44  ;;  %894 = vmatpush.msra.mxu3 %v3213_v18 }
  0x2d   :  { %173 = vmatpush.msra.mxu0 %v3229_v38  ;;  %502 = vmatpush.msra.mxu1 %v501_v32  ;;  %v1737_v32 = vand.u32 4294901760, %v1736_v62  ;;  %v525_v53 = vand.u32 4294901760, %v524_v37  ;;  %v3318_v62 = vand.u32 4294901760, %v75_v47 }
  0x2e   :  { %179 = vmatmul.f32.vlgmr.msra.gmra.mxu0 %v178_v61  ;;  %700 = vmatpush.msra.mxu2 %v3246_v56  ;;  %v1743_v61 = vand.u32 4294901760, %v1742_v13  ;;  %v92_v13 = vld [vmem:[#allocation3 + $0x70] sm:$0xff] }
  0x2f   :  { %508 = vmatpush.msra.mxu1 %v507_v60  ;;  %896 = vmatpush.msra.mxu3 %v3229_v38  ;;  %v192_v60 = vand.u32 4294901760, %v191_v45 }
  0x30   :  { %703 = vmatpush.msra.mxu2 %v3261_v7  ;;  %900 = vmatmul.f32.vlgmr.msra.gmra.mxu3 %v176_v49 }
  0x31   :  { %514 = vmatpush.msra.mxu1 %v513_v8  ;;  %706 = vmatmul.f32.vlgmr.msra.gmra.mxu2 %v3219_v30  ;;  %v3324_v30 = vsub.f32 %v75_v47, %v3318_v62  ;;  %v193_v14 = vsub.f32 %v191_v45, %v192_v60 }
  0x32   :  { %1445 = vmatpush.msrb.mxu2 %v3221_v31  ;;  %1093 = vmatpush.msrb.mxu0 %v433_v22  ;;  %v199_v22 = vsub.f32 %v84_v46, %v3316_v0 }
  0x33   :  { %520 = vmatpush.msra.mxu1 %v519_v42  ;;  %1738 = vmatpush.msrb.mxu3 %v1737_v32  ;;  %v4467_v39 = vand.u32 4294901760, %v3324_v30  ;;  %v86_v42 = vld [vmem:[#allocation3 + $0x40] sm:$0xff]  ;;  %v3391_v32 = vand.u32 4294901760, %v92_v13 }
  0x34   :  { %1447 = vmatpush.msrb.mxu2 %v3251_v58  ;;  %1097 = vmatpush.msrb.mxu0 %v439_v23  ;;  %v194_v23 = vand.u32 4294901760, %v193_v14  ;;  %v200_v49 = vand.u32 4294901760, %v199_v22 }
  0x35   :  { %526 = vmatpush.msra.mxu1 %v525_v53  ;;  %1744 = vmatpush.msrb.mxu3 %v1743_v61  ;;  %v1748_v15 = vsub.f32 %v3324_v30, %v4467_v39  ;;  %v3338_v53 = vand.u32 4294901760, %v86_v42  ;;  %v4617_v61 = vand.u32 4294901760, %v3233_v44 }
  0x36   :  { %187 = vmatmul.f32.gmra.mxu0 %v186_v12  ;;  %528 = vmatmul.f32.vlgmr.msra.gmra.mxu1 %v3204_v6  ;;  %v231_v12 = vsub.f32 %v92_v13, %v3391_v32 }
  0x37   :  { %1284 = vmatpush.msrb.mxu1 %v3085_v3  ;;  %1449 = vmatpush.msrb.mxu2 %v3318_v62  ;;  %v1749_v3 = vand.u32 4294901760, %v1748_v15  ;;  %v207_v16 = vsub.f32 %v86_v42, %v3338_v53  ;;  %v96_v15 = vld [vmem:[#allocation3 + $0x90] sm:$0xff] }
  0x38   :  { %906 = vmatmul.f32.gmra.mxu3 %v184_v54  ;;  %1101 = vmatpush.msrb.mxu0 %v445_v24  ;;  %v88_v24 = vld [vmem:[#allocation3 + $0x50] sm:$0xff]  ;;  %v90_v54 = vld [vmem:[#allocation3 + $0x60] sm:$0xff]  ;;  %v232_v14 = vand.u32 4294901760, %v231_v12 }
  0x39   :  { %711 = vmatmul.f32.gmra.mxu2 %v3270_v34  ;;  %1286 = vmatpush.msrb.mxu1 %v3087_v4  ;;  %v201_v4 = vsub.f32 %v199_v22, %v200_v49  ;;  %v208_v20 = vand.u32 4294901760, %v207_v16  ;;  %v3377_v47 = vand.u32 4294901760, %v90_v54 }
  0x3a   :  { %1105 = vmatpush.msrb.mxu0 %v451_v27  ;;  %1750 = vmatpush.msrb.mxu3 %v1749_v3 }
  0x3b   :  { %1288 = vmatpush.msrb.mxu1 %v3089_v5  ;;  %v74_v5 = vld [vmem:[#allocation6 + $0xe0] sm:$0xff]  ;;  %v202_v19 = vand.u32 4294901760, %v201_v4  ;;  %v223_v37 = vsub.f32 %v90_v54, %v3377_v47  ;;  %v3427_v4 = vand.u32 4294901760, %v96_v15 }
  0x3c   :  { %1109 = vmatpush.msrb.mxu0 %v457_v33  ;;  %v3354_v27 = vand.u32 4294901760, %v74_v5  ;;  %v4610_v33 = vand.u32 4294901760, %v3131_v29 }
  0x3d   :  { %1290 = vmatpush.msrb.mxu1 %v3091_v9  ;;  %v3352_v9 = vand.u32 4294901760, %v88_v24  ;;  %4621 = vst [vmem:[#allocation13_spill] sm:$0xff] %v3427_v4 }
  0x3e   :  { %195 = vmatmul.f32.gmra.mxu0 %v194_v23  ;;  %532 = vmatmul.f32.gmra.mxu1 %v3241_v50  ;;  %v72_v23 = vld [vmem:[#allocation6 + $0xd0] sm:$0xff] }
  0x3f   :  { %1292 = vmatpush.msrb.mxu1 %v3093_v10  ;;  %1113 = vmatpush.msrb.mxu0 %v463_v36  ;;  %v3361_v10 = vsub.f32 %v74_v5, %v3354_v27  ;;  %v215_v36 = vsub.f32 %v88_v24, %v3352_v9 }
  0x40   :  { %912 = vmatmul.f32.gmra.mxu3 %v192_v60  ;;  %1451 = vmatpush.msrb.mxu2 %v3354_v27  ;;  %v94_v60 = vld [vmem:[#allocation3 + $0x80] sm:$0xff] }
  0x41   :  { %716 = vmatmul.f32.gmra.mxu2 %v191_v45  ;;  %1294 = vmatpush.msrb.mxu1 %v3095_v11  ;;  %v209_v11 = vsub.f32 %v207_v16, %v208_v20  ;;  %v4466_v29 = vand.u32 4294901760, %v3361_v10  ;;  %v216_v45 = vand.u32 4294901760, %v215_v36 }
  0x42   :  { %1117 = vmatpush.msrb.mxu0 %v4610_v33  ;;  %v98_v33 = vld [vmem:[#allocation3 + $0xa0] sm:$0xff] }
  0x43   :  { %1296 = vmatpush.msrb.mxu1 %v3108_v17  ;;  %v4612_v17 = vand.u32 4294901760, %v3162_v43  ;;  %v1754_v40 = vsub.f32 %v3361_v10, %v4466_v29  ;;  %v210_v34 = vand.u32 4294901760, %v209_v11  ;;  %v4614_v43 = vand.u32 4294901760, %v3187_v55  ;;  %v73_v55 = vld [vmem:[#allocation6 + $0xd8] sm:$0xff] }
  0x44   :  { %1121 = vmatpush.msrb.mxu0 %v4611_v21  ;;  %v3393_v46 = vand.u32 4294901760, %v73_v55  ;;  %v3444_v54 = vand.u32 4294901760, %v98_v33 }
  0x45   :  { %1298 = vmatpush.msrb.mxu1 %v3124_v25  ;;  %v4613_v25 = vand.u32 4294901760, %v3174_v48  ;;  %v1755_v8 = vand.u32 4294901760, %v1754_v40  ;;  %v217_v48 = vsub.f32 %v215_v36, %v216_v45 }
  0x46   :  { %203 = vmatmul.f32.gmra.mxu0 %v202_v19  ;;  %536 = vmatmul.f32.gmra.mxu1 %v3289_v52  ;;  %v247_v19 = vsub.f32 %v96_v15, %v3427_v4  ;;  %4622 = vst [vmem:[#allocation14_spill] sm:$0xff] %v3444_v54 }
  0x47   :  { %1125 = vmatpush.msrb.mxu0 %v4612_v17  ;;  %1300 = vmatpush.msrb.mxu1 %v3128_v28  ;;  %v4615_v28 = vand.u32 4294901760, %v3202_v2  ;;  %v224_v2 = vand.u32 4294901760, %v223_v37 }
  0x48   :  { %918 = vmatmul.f32.gmra.mxu3 %v200_v49  ;;  %1453 = vmatpush.msrb.mxu2 %v3393_v46 }
  0x49   :  { %721 = vmatmul.f32.gmra.mxu2 %v199_v22  ;;  %1129 = vmatpush.msrb.mxu0 %v4613_v25  ;;  %v3416_v22 = vand.u32 4294901760, %v94_v60  ;;  %v255_v25 = vsub.f32 %v98_v33, %v3444_v54 }
  0x4a   :  { %1302 = vmatpush.msrb.mxu1 %v3146_v35  ;;  %1756 = vmatpush.msrb.mxu3 %v1755_v8  ;;  %v4616_v35 = vand.u32 4294901760, %v3216_v26  ;;  %v4618_v26 = vand.u32 4294901760, %v3246_v56 }
  0x4b   :  { %1133 = vmatpush.msrb.mxu0 %v4614_v43  ;;  %4620 = vst [vmem:[#allocation12_spill] sm:$0xff] %v3416_v22  ;;  %v256_v43 = vand.u32 4294901760, %v255_v25 }
  0x4c   :  { %1304 = vmatpush.msrb.mxu1 %v3158_v41  ;;  %v218_v41 = vand.u32 4294901760, %v217_v48 }
  0x4d   :  { %1137 = vmatpush.msrb.mxu0 %v4615_v28  ;;  %v257_v13 = vsub.f32 %v255_v25, %v256_v43 }
  0x4e   :  { %211 = vmatmul.f32.gmra.mxu0 %v210_v34  ;;  %540 = vmatmul.f32.gmra.mxu1 %v3316_v0  ;;  %v100_v34 = vld [vmem:[#allocation3 + $0xb0] sm:$0xff] }
  0x4f   :  { %1306 = vmatpush.msrb.mxu1 %v3177_v51  ;;  %1141 = vmatpush.msrb.mxu0 %v4616_v35  ;;  %v3400_v51 = vsub.f32 %v73_v55, %v3393_v46  ;;  %v3448_v28 = vand.u32 4294901760, %v100_v34 }
  0x50   :  { %924 = vmatmul.f32.gmra.mxu3 %v208_v20 }
  0x51   :  { %726 = vmatmul.f32.gmra.mxu2 %v207_v16  ;;  %1308 = vmatpush.msrb.mxu1 %v3190_v59  ;;  %v225_v59 = vsub.f32 %v223_v37, %v224_v2  ;;  %v4465_v44 = vand.u32 4294901760, %v3400_v51  ;;  %v3429_v16 = vand.u32 4294901760, %v72_v23  ;;  %4623 = vst [vmem:[#allocation15_spill] sm:$0xff] %v3448_v28  ;;  %v263_v35 = vsub.f32 %v100_v34, %v3448_v28  ;;  %v69_v34 = vld [vmem:[#allocation6 + $0xb8] sm:$0xff] }
  0x52   :  { %1145 = vmatpush.msrb.mxu0 %v4617_v61  ;;  %v258_v61 = vand.u32 4294901760, %v257_v13  ;;  %v3490_v13 = vand.u32 4294901760, %v69_v34 }
  0x53   :  { %1310 = vmatpush.msrb.mxu1 %v3199_v1  ;;  %v4619_v1 = vand.u32 4294901760, %v3261_v7  ;;  %v1760_v56 = vsub.f32 %v3400_v51, %v4465_v44  ;;  %v239_v7 = vsub.f32 %v94_v60, %v3416_v22  ;;  %1455 = vmatpush.msrb.mxu2 %v3429_v16  ;;  %v3434_v24 = vsub.f32 %v72_v23, %v3429_v16 }
  0x54   :  { %1149 = vmatpush.msrb.mxu0 %v4618_v26  ;;  %v264_v26 = vand.u32 4294901760, %v263_v35 }
  0x55   :  { %1312 = vmatpush.msrb.mxu1 %v3213_v18  ;;  %v226_v18 = vand.u32 4294901760, %v225_v59  ;;  %v1761_v42 = vand.u32 4294901760, %v1760_v56  ;;  %v240_v3 = vand.u32 4294901760, %v239_v7  ;;  %v4464_v20 = vand.u32 4294901760, %v3434_v24  ;;  %v104_v56 = vld [vmem:[#allocation3 + $0xd0] sm:$0xff] }
  0x56   :  { %219 = vmatmul.f32.gmra.mxu0 %v218_v41  ;;  %544 = vmatmul.f32.gmra.mxu1 %v3338_v53  ;;  %v102_v41 = vld [vmem:[#allocation3 + $0xc0] sm:$0xff]  ;;  %v265_v60 = vsub.f32 %v263_v35, %v264_v26 }
  0x57   :  { %1153 = vmatpush.msrb.mxu0 %v4619_v1  ;;  %1314 = vmatpush.msrb.mxu1 %v3229_v38  ;;  %v233_v38 = vsub.f32 %v231_v12, %v232_v14  ;;  %v241_v5 = vsub.f32 %v239_v7, %v240_v3  ;;  %v1766_v21 = vsub.f32 %v3434_v24, %v4464_v20  ;;  %v3464_v59 = vand.u32 4294901760, %v102_v41 }
  0x58   :  { %930 = vmatmul.f32.gmra.mxu3 %v216_v45  ;;  %v71_v45 = vld [vmem:[#allocation6 + $0xc8] sm:$0xff] }
  0x59   :  { %1960 = vmatpush.msra.mxu0 %v3249_v57  ;;  %731 = vmatmul.f32.gmra.mxu2 %v215_v36  ;;  %v234_v49 = vand.u32 4294901760, %v233_v38  ;;  %v242_v11 = vand.u32 4294901760, %v241_v5  ;;  %v248_v36 = vand.u32 4294901760, %v247_v19  ;;  %v1767_v17 = vand.u32 4294901760, %v1766_v21  ;;  %4624 = vst [vmem:[#allocation16_spill] sm:$0xff] %v3464_v59  ;;  %v106_v5 = vld [vmem:[#allocation3 + $0xe0] sm:$0xff] }
  0x5a   :  { %2168 = vmatpush.msra.mxu1 %v3221_v31  ;;  %1762 = vmatpush.msrb.mxu3 %v1761_v42  ;;  %v3450_v48 = vand.u32 4294901760, %v71_v45  ;;  %v271_v1 = vsub.f32 %v102_v41, %v3464_v59  ;;  %v3468_v38 = vand.u32 4294901760, %v104_v56 }
  0x5b   :  { %1963 = vmatpush.msra.mxu0 %v3264_v63  ;;  %v249_v40 = vsub.f32 %v247_v19, %v248_v36 }
  0x5c   :  { %2170 = vmatpush.msra.mxu1 %v3251_v58  ;;  %1768 = vmatpush.msrb.mxu3 %v1767_v17  ;;  %v272_v42 = vand.u32 4294901760, %v271_v1  ;;  %4625 = vst [vmem:[#allocation17_spill] sm:$0xff] %v3468_v38 }
  0x5d   :  { %1966 = vmatpush.msra.mxu0 %v3324_v30  ;;  %v250_v8 = vand.u32 4294901760, %v249_v40  ;;  %1457 = vmatpush.msrb.mxu2 %v3450_v48 }
  0x5e   :  { %2172 = vmatpush.msra.mxu1 %v3318_v62  ;;  %227 = vmatmul.f32.gmra.mxu0 %v226_v18  ;;  %v70_v18 = vld [vmem:[#allocation6 + $0xc0] sm:$0xff]  ;;  %v273_v23 = vsub.f32 %v271_v1, %v272_v42 }
  0x5f   :  { %548 = vmatmul.f32.gmra.mxu1 %v3352_v9  ;;  %1969 = vmatpush.msra.mxu0 %v3361_v10 }
  0x60   :  { %2174 = vmatpush.msra.mxu1 %v3354_v27  ;;  %936 = vmatmul.f32.gmra.mxu3 %v224_v2  ;;  %v274_v33 = vand.u32 4294901760, %v273_v23  ;;  %v112_v23 = vld [vmem:[#allocation3 + $0x110] sm:$0xff] }
  0x61   :  { %736 = vmatmul.f32.gmra.mxu2 %v223_v37  ;;  %1972 = vmatpush.msra.mxu0 %v3400_v51  ;;  %v3454_v37 = vsub.f32 %v71_v45, %v3450_v48 }
  0x62   :  { %2176 = vmatpush.msra.mxu1 %v3393_v46 }
  0x63   :  { %1975 = vmatpush.msra.mxu0 %v3434_v24  ;;  %v4463_v55 = vand.u32 4294901760, %v3454_v37 }
  0x64   :  { %2178 = vmatpush.msra.mxu1 %v3429_v16 }
  0x65   :  { %1978 = vmatpush.msra.mxu0 %v3454_v37  ;;  %v1772_v2 = vsub.f32 %v3454_v37, %v4463_v55  ;;  %v118_v55 = vld [vmem:[#allocation3 + $0x140] sm:$0xff] }
  0x66   :  { %235 = vmatmul.f32.gmra.mxu0 %v234_v49  ;;  %2180 = vmatpush.msra.mxu1 %v3450_v48  ;;  %v279_v49 = vsub.f32 %v104_v56, %v3468_v38 }
  0x67   :  { %552 = vmatmul.f32.gmra.mxu1 %v3377_v47 }
  0x68   :  { %942 = vmatmul.f32.gmra.mxu3 %v232_v14  ;;  %v266_v14 = vand.u32 4294901760, %v265_v60  ;;  %v280_v21 = vand.u32 4294901760, %v279_v49 }
  0x69   :  { %741 = vmatmul.f32.gmra.mxu2 %v231_v12  ;;  %v1773_v12 = vand.u32 4294901760, %v1772_v2 }
  0x6a   :  { %v281_v17 = vsub.f32 %v279_v49, %v280_v21 }
  0x6b   :  { %1774 = vmatpush.msrb.mxu3 %v1773_v12 }
  0x6c   :  { %v282_v45 = vand.u32 4294901760, %v281_v17 }
  0x6e   :  { %243 = vmatmul.f32.gmra.mxu0 %v242_v11  ;;  %v3484_v11 = vand.u32 4294901760, %v106_v5 }
  0x6f   :  { %556 = vmatmul.f32.gmra.mxu1 %v3391_v32 }
  0x70   :  { %948 = vmatmul.f32.gmra.mxu3 %v240_v3  ;;  %4626 = vst [vmem:[#allocation18_spill] sm:$0xff] %v3484_v11  ;;  %v287_v40 = vsub.f32 %v106_v5, %v3484_v11  ;;  %v68_v5 = vld [vmem:[#allocation6 + $0xb0] sm:$0xff] }
  0x71   :  { %746 = vmatmul.f32.gmra.mxu2 %v239_v7  ;;  %v3470_v7 = vand.u32 4294901760, %v70_v18 }
  0x73   :  { %1459 = vmatpush.msrb.mxu2 %v3470_v7  ;;  %v3474_v15 = vsub.f32 %v70_v18, %v3470_v7  ;;  %2182 = vmatpush.msra.mxu1 %v3470_v7 }
  0x75   :  { %v4462_v3 = vand.u32 4294901760, %v3474_v15  ;;  %1981 = vmatpush.msra.mxu0 %v3474_v15  ;;  %1461 = vmatpush.msrb.mxu2 %v3490_v13 }
  0x76   :  { %251 = vmatmul.f32.gmra.mxu0 %v250_v8  ;;  %v288_v8 = vand.u32 4294901760, %v287_v40  ;;  %2184 = vmatpush.msra.mxu1 %v3490_v13 }
  0x77   :  { %560 = vmatmul.f32.gmra.mxu1 %v3416_v22 }
  0x78   :  { %954 = vmatmul.f32.gmra.mxu3 %v248_v36  ;;  %v289_v41 = vsub.f32 %v287_v40, %v288_v8 }
  0x79   :  { %751 = vmatmul.f32.gmra.mxu2 %v247_v19  ;;  %v1778_v19 = vsub.f32 %v3474_v15, %v4462_v3 }
  0x7a   :  { %v290_v60 = vand.u32 4294901760, %v289_v41 }
  0x7b   :  { %v1779_v36 = vand.u32 4294901760, %v1778_v19 }
  0x7d   :  { %1780 = vmatpush.msrb.mxu3 %v1779_v36 }
  0x7e   :  { %259 = vmatmul.f32.gmra.mxu0 %v258_v61 }
  0x7f   :  { %564 = vmatmul.f32.gmra.mxu1 %v3427_v4 }
  0x80   :  { %960 = vmatmul.f32.gmra.mxu3 %v256_v43 }
  0x81   :  { %756 = vmatmul.f32.gmra.mxu2 %v255_v25  ;;  %v108_v25 = vld [vmem:[#allocation3 + $0xf0] sm:$0xff] }
  0x82   :  { %v3488_v43 = vand.u32 4294901760, %v108_v25 }
  0x84   :  { %4627 = vst [vmem:[#allocation19_spill] sm:$0xff] %v3488_v43  ;;  %v295_v2 = vsub.f32 %v108_v25, %v3488_v43 }
  0x86   :  { %267 = vmatmul.f32.gmra.mxu0 %v266_v14 }
  0x87   :  { %568 = vmatmul.f32.gmra.mxu1 %v3444_v54 }
  0x88   :  { %966 = vmatmul.f32.gmra.mxu3 %v264_v26  ;;  %v110_v26 = vld [vmem:[#allocation3 + $0x100] sm:$0xff] }
  0x89   :  { %761 = vmatmul.f32.gmra.mxu2 %v263_v35  ;;  %v3494_v35 = vsub.f32 %v69_v34, %v3490_v13  ;;  %v3504_v56 = vand.u32 4294901760, %v110_v26  ;;  %v114_v34 = vld [vmem:[#allocation3 + $0x120] sm:$0xff] }
  0x8b   :  { %v4461_v61 = vand.u32 4294901760, %v3494_v35  ;;  %1984 = vmatpush.msra.mxu0 %v3494_v35  ;;  %4628 = vst [vmem:[#allocation20_spill] sm:$0xff] %v3504_v56 }
  0x8d   :  { %v1784_v12 = vsub.f32 %v3494_v35, %v4461_v61 }
  0x8e   :  { %275 = vmatmul.f32.gmra.mxu0 %v274_v33 }
  0x8f   :  { %572 = vmatmul.f32.gmra.mxu1 %v3448_v28  ;;  %v1785_v18 = vand.u32 4294901760, %v1784_v12 }
  0x90   :  { %972 = vmatmul.f32.gmra.mxu3 %v272_v42  ;;  %v303_v42 = vsub.f32 %v110_v26, %v3504_v56  ;;  %v3524_v26 = vand.u32 4294901760, %v114_v34 }
  0x91   :  { %766 = vmatmul.f32.gmra.mxu2 %v271_v1  ;;  %v296_v1 = vand.u32 4294901760, %v295_v2  ;;  %1786 = vmatpush.msrb.mxu3 %v1785_v18 }
  0x92   :  { %v304_v33 = vand.u32 4294901760, %v303_v42  ;;  %4630 = vst [vmem:[#allocation22_spill] sm:$0xff] %v3524_v26 }
  0x93   :  { %v297_v14 = vsub.f32 %v295_v2, %v296_v1 }
  0x94   :  { %v305_v17 = vsub.f32 %v303_v42, %v304_v33 }
  0x95   :  { %v298_v19 = vand.u32 4294901760, %v297_v14  ;;  %v319_v14 = vsub.f32 %v114_v34, %v3524_v26 }
  0x96   :  { %283 = vmatmul.f32.gmra.mxu0 %v282_v45 }
  0x97   :  { %576 = vmatmul.f32.gmra.mxu1 %v3464_v59 }
  0x98   :  { %978 = vmatmul.f32.gmra.mxu3 %v280_v21  ;;  %v3508_v21 = vand.u32 4294901760, %v112_v23 }
  0x99   :  { %771 = vmatmul.f32.gmra.mxu2 %v279_v49  ;;  %v3510_v49 = vand.u32 4294901760, %v68_v5 }
  0x9a   :  { %4629 = vst [vmem:[#allocation21_spill] sm:$0xff] %v3508_v21 }
  0x9b   :  { %1463 = vmatpush.msrb.mxu2 %v3510_v49  ;;  %v3514_v36 = vsub.f32 %v68_v5, %v3510_v49  ;;  %2186 = vmatpush.msra.mxu1 %v3510_v49 }
  0x9d   :  { %v4460_v25 = vand.u32 4294901760, %v3514_v36  ;;  %1987 = vmatpush.msra.mxu0 %v3514_v36 }
  0x9e   :  { %291 = vmatmul.f32.gmra.mxu0 %v290_v60 }
  0x9f   :  { %580 = vmatmul.f32.gmra.mxu1 %v3468_v38  ;;  %v1790_v45 = vsub.f32 %v3514_v36, %v4460_v25 }
  0xa0   :  { %984 = vmatmul.f32.gmra.mxu3 %v288_v8  ;;  %v306_v8 = vand.u32 4294901760, %v305_v17 }
  0xa1   :  { %776 = vmatmul.f32.gmra.mxu2 %v287_v40  ;;  %v311_v40 = vsub.f32 %v112_v23, %v3508_v21  ;;  %v1791_v12 = vand.u32 4294901760, %v1790_v45  ;;  %v116_v23 = vld [vmem:[#allocation3 + $0x130] sm:$0xff] }
  0xa3   :  { %v312_v41 = vand.u32 4294901760, %v311_v40  ;;  %1792 = vmatpush.msrb.mxu3 %v1791_v12 }
  0xa5   :  { %v313_v18 = vsub.f32 %v311_v40, %v312_v41 }
  0xa6   :  { %299 = vmatmul.f32.gmra.mxu0 %v298_v19  ;;  %v320_v19 = vand.u32 4294901760, %v319_v14 }
  0xa7   :  { %584 = vmatmul.f32.gmra.mxu1 %v3484_v11  ;;  %v314_v5 = vand.u32 4294901760, %v313_v18 }
  0xa8   :  { %990 = vmatmul.f32.gmra.mxu3 %v296_v1  ;;  %v67_v1 = vld [vmem:[#allocation6 + $0xa8] sm:$0xff] }
  0xa9   :  { %781 = vmatmul.f32.gmra.mxu2 %v295_v2  ;;  %v3528_v2 = vand.u32 4294901760, %v116_v23  ;;  %v3530_v17 = vand.u32 4294901760, %v67_v1 }
  0xab   :  { %v180_v60 = vpop.f32.mrf.mxu0  ;;  %4631 = vst [vmem:[#allocation23_spill] sm:$0xff] %v3528_v2  ;;  %1465 = vmatpush.msrb.mxu2 %v3530_v17  ;;  %v3534_v3 = vsub.f32 %v67_v1, %v3530_v17  ;;  %2188 = vmatpush.msra.mxu1 %v3530_v17  ;;  %v327_v34 = vsub.f32 %v116_v23, %v3528_v2 }
  0xad   :  { %v4470_v18 = vand.u32 4294901760, %v3534_v3  ;;  %1990 = vmatpush.msra.mxu0 %v3534_v3 }
  0xae   :  { %307 = vmatmul.f32.gmra.mxu0 %v306_v8 }
  0xaf   :  { %588 = vmatmul.f32.gmra.mxu1 %v3488_v43  ;;  %v1796_v1 = vsub.f32 %v3534_v3, %v4470_v18 }
  0xb0   :  { %996 = vmatmul.f32.gmra.mxu3 %v304_v33  ;;  %v321_v33 = vsub.f32 %v319_v14, %v320_v19 }
  0xb1   :  { %786 = vmatmul.f32.gmra.mxu2 %v303_v42 }
  0xb3   :  { %v188_v25 = vpop.f32.mrf.mxu0  ;;  %v529_v45 = vpop.f32.mrf.mxu1 }
  0xb4   :  { %v530_v61 = vadd.f32 %v529_v45, %v180_v60  ;;  %v707_v12 = vpop.f32.mrf.mxu2  ;;  %v901_v8 = vpop.f32.mrf.mxu3  ;;  %v3546_v45 = vand.u32 4294901760, %v118_v55 }
  0xb6   :  { %v708_v42 = vadd.f32 %v707_v12, %v530_v61  ;;  %315 = vmatmul.f32.gmra.mxu0 %v314_v5  ;;  %v322_v61 = vand.u32 4294901760, %v321_v33  ;;  %v328_v5 = vand.u32 4294901760, %v327_v34  ;;  %4633 = vst [vmem:[#allocation25_spill] sm:$0xff] %v3546_v45  ;;  %v1797_v12 = vand.u32 4294901760, %v1796_v1  ;;  %v66_v33 = vld [vmem:[#allocation6 + $0xa0] sm:$0xff] }
  0xb7   :  { %592 = vmatmul.f32.gmra.mxu1 %v3504_v56 }
  0xb8   :  { %v3541_v60 = vadd.f32 %v901_v8, %v708_v42  ;;  %1002 = vmatmul.f32.gmra.mxu3 %v312_v41  ;;  %v329_v41 = vsub.f32 %v327_v34, %v328_v5  ;;  %v335_v8 = vsub.f32 %v118_v55, %v3546_v45  ;;  %v120_v42 = vld [vmem:[#allocation3 + $0x150] sm:$0xff] }
  0xb9   :  { %791 = vmatmul.f32.gmra.mxu2 %v311_v40  ;;  %1798 = vmatpush.msrb.mxu3 %v1797_v12 }
  0xba   :  { %4632 = vst [vmem:[#allocation24_spill] sm:$0xff] %v3541_v60  ;;  %v330_v1 = vand.u32 4294901760, %v329_v41  ;;  %v336_v18 = vand.u32 4294901760, %v335_v8  ;;  %v3552_v60 = vand.u32 4294901760, %v120_v42  ;;  %v122_v41 = vld [vmem:[#allocation3 + $0x160] sm:$0xff] }
  0xbb   :  { %v196_v20 = vpop.f32.mrf.mxu0  ;;  %v533_v23 = vpop.f32.mrf.mxu1 }
  0xbc   :  { %v534_v44 = vadd.f32 %v533_v23, %v188_v25  ;;  %v712_v29 = vpop.f32.mrf.mxu2  ;;  %v907_v39 = vpop.f32.mrf.mxu3  ;;  %4635 = vst [vmem:[#allocation27_spill] sm:$0xff] %v3552_v60  ;;  %v3554_v25 = vand.u32 4294901760, %v66_v33 }
  0xbe   :  { %v713_v56 = vadd.f32 %v712_v29, %v534_v44  ;;  %323 = vmatmul.f32.gmra.mxu0 %v322_v61  ;;  %1467 = vmatpush.msrb.mxu2 %v3554_v25  ;;  %v3558_v55 = vsub.f32 %v66_v33, %v3554_v25 }
  0xbf   :  { %596 = vmatmul.f32.gmra.mxu1 %v3508_v21 }
  0xc0   :  { %v3550_v40 = vadd.f32 %v907_v39, %v713_v56  ;;  %1008 = vmatmul.f32.gmra.mxu3 %v320_v19  ;;  %2190 = vmatpush.msra.mxu1 %v3554_v25  ;;  %v337_v56 = vsub.f32 %v335_v8, %v336_v18  ;;  %v4479_v19 = vand.u32 4294901760, %v3558_v55 }
  0xc1   :  { %796 = vmatmul.f32.gmra.mxu2 %v319_v14  ;;  %v343_v14 = vsub.f32 %v120_v42, %v3552_v60  ;;  %1993 = vmatpush.msra.mxu0 %v3558_v55 }
  0xc2   :  { %4634 = vst [vmem:[#allocation26_spill] sm:$0xff] %v3550_v40  ;;  %v1802_v33 = vsub.f32 %v3558_v55, %v4479_v19 }
  0xc3   :  { %v204_v12 = vpop.f32.mrf.mxu0  ;;  %v537_v29 = vpop.f32.mrf.mxu1 }
  0xc4   :  { %v538_v44 = vadd.f32 %v537_v29, %v196_v20  ;;  %v717_v61 = vpop.f32.mrf.mxu2  ;;  %v913_v23 = vpop.f32.mrf.mxu3  ;;  %v338_v29 = vand.u32 4294901760, %v337_v56  ;;  %v65_v56 = vld [vmem:[#allocation6 + $0x98] sm:$0xff] }
  0xc6   :  { %v718_v39 = vadd.f32 %v717_v61, %v538_v44  ;;  %331 = vmatmul.f32.gmra.mxu0 %v330_v1  ;;  %v344_v1 = vand.u32 4294901760, %v343_v14  ;;  %v3570_v44 = vand.u32 4294901760, %v122_v41  ;;  %v1803_v61 = vand.u32 4294901760, %v1802_v33 }
  0xc7   :  { %600 = vmatmul.f32.gmra.mxu1 %v3524_v26 }
  0xc8   :  { %v3565_v20 = vadd.f32 %v913_v23, %v718_v39  ;;  %1014 = vmatmul.f32.gmra.mxu3 %v328_v5  ;;  %4637 = vst [vmem:[#allocation29_spill] sm:$0xff] %v3570_v44  ;;  %v345_v5 = vsub.f32 %v343_v14, %v344_v1  ;;  %v351_v23 = vsub.f32 %v122_v41, %v3570_v44  ;;  %v124_v39 = vld [vmem:[#allocation3 + $0x170] sm:$0xff] }
  0xc9   :  { %801 = vmatmul.f32.gmra.mxu2 %v327_v34  ;;  %1804 = vmatpush.msrb.mxu3 %v1803_v61 }
  0xca   :  { %4636 = vst [vmem:[#allocation28_spill] sm:$0xff] %v3565_v20  ;;  %v346_v33 = vand.u32 4294901760, %v345_v5  ;;  %v352_v19 = vand.u32 4294901760, %v351_v23  ;;  %v3576_v20 = vand.u32 4294901760, %v124_v39  ;;  %v126_v5 = vld [vmem:[#allocation3 + $0x180] sm:$0xff] }
  0xcb   :  { %v212_v26 = vpop.f32.mrf.mxu0  ;;  %v541_v42 = vpop.f32.mrf.mxu1 }
  0xcc   :  { %v542_v40 = vadd.f32 %v541_v42, %v204_v12  ;;  %v722_v21 = vpop.f32.mrf.mxu2  ;;  %v919_v43 = vpop.f32.mrf.mxu3  ;;  %4639 = vst [vmem:[#allocation31_spill] sm:$0xff] %v3576_v20  ;;  %v3578_v12 = vand.u32 4294901760, %v65_v56 }
  0xce   :  { %v723_v11 = vadd.f32 %v722_v21, %v542_v40  ;;  %339 = vmatmul.f32.gmra.mxu0 %v338_v29  ;;  %1469 = vmatpush.msrb.mxu2 %v3578_v12  ;;  %v3582_v41 = vsub.f32 %v65_v56, %v3578_v12 }
  0xcf   :  { %604 = vmatmul.f32.gmra.mxu1 %v3528_v2 }
  0xd0   :  { %v3574_v34 = vadd.f32 %v919_v43, %v723_v11  ;;  %1020 = vmatmul.f32.gmra.mxu3 %v336_v18  ;;  %2192 = vmatpush.msra.mxu1 %v3578_v12  ;;  %v353_v43 = vsub.f32 %v351_v23, %v352_v19  ;;  %v359_v18 = vsub.f32 %v124_v39, %v3576_v20 }
  0xd1   :  { %806 = vmatmul.f32.gmra.mxu2 %v335_v8  ;;  %v4488_v8 = vand.u32 4294901760, %v3582_v41  ;;  %1996 = vmatpush.msra.mxu0 %v3582_v41 }
  0xd2   :  { %4638 = vst [vmem:[#allocation30_spill] sm:$0xff] %v3574_v34 }
  0xd3   :  { %v220_v61 = vpop.f32.mrf.mxu0  ;;  %v545_v21 = vpop.f32.mrf.mxu1  ;;  %v1808_v56 = vsub.f32 %v3582_v41, %v4488_v8 }
  0xd4   :  { %v546_v40 = vadd.f32 %v545_v21, %v212_v26  ;;  %v727_v29 = vpop.f32.mrf.mxu2  ;;  %v925_v42 = vpop.f32.mrf.mxu3  ;;  %v354_v21 = vand.u32 4294901760, %v353_v43  ;;  %v64_v43 = vld [vmem:[#allocation6 + $0x90] sm:$0xff] }
  0xd6   :  { %v728_v11 = vadd.f32 %v727_v29, %v546_v40  ;;  %347 = vmatmul.f32.gmra.mxu0 %v346_v33  ;;  %v360_v33 = vand.u32 4294901760, %v359_v18  ;;  %v3594_v40 = vand.u32 4294901760, %v126_v5  ;;  %v1809_v29 = vand.u32 4294901760, %v1808_v56 }
  0xd7   :  { %608 = vmatmul.f32.gmra.mxu1 %v3546_v45 }
  0xd8   :  { %v3589_v26 = vadd.f32 %v925_v42, %v728_v11  ;;  %1026 = vmatmul.f32.gmra.mxu3 %v344_v1  ;;  %4641 = vst [vmem:[#allocation33_spill] sm:$0xff] %v3594_v40  ;;  %v361_v1 = vsub.f32 %v359_v18, %v360_v33  ;;  %v367_v42 = vsub.f32 %v126_v5, %v3594_v40  ;;  %v128_v11 = vld [vmem:[#allocation3 + $0x190] sm:$0xff] }
  0xd9   :  { %811 = vmatmul.f32.gmra.mxu2 %v343_v14  ;;  %1810 = vmatpush.msrb.mxu3 %v1809_v29 }
  0xda   :  { %4640 = vst [vmem:[#allocation32_spill] sm:$0xff] %v3589_v26  ;;  %v362_v56 = vand.u32 4294901760, %v361_v1  ;;  %v368_v8 = vand.u32 4294901760, %v367_v42  ;;  %v3600_v26 = vand.u32 4294901760, %v128_v11  ;;  %v130_v1 = vld [vmem:[#allocation3 + $0x1a0] sm:$0xff] }
  0xdb   :  { %v228_v45 = vpop.f32.mrf.mxu0 }
  0xdc   :  { %v549_v39 = vpop.f32.mrf.mxu1  ;;  %v732_v2 = vpop.f32.mrf.mxu2 }
  0xdd   :  { %v550_v34 = vadd.f32 %v549_v39, %v220_v61  ;;  %v931_v38 = vpop.f32.mrf.mxu3  ;;  %v3602_v61 = vand.u32 4294901760, %v64_v43 }
  0xde   :  { %355 = vmatmul.f32.gmra.mxu0 %v354_v21 }
  0xdf   :  { %v733_v59 = vadd.f32 %v732_v2, %v550_v34  ;;  %612 = vmatmul.f32.gmra.mxu1 %v3552_v60  ;;  %1471 = vmatpush.msrb.mxu2 %v3602_v61  ;;  %v3606_v5 = vsub.f32 %v64_v43, %v3602_v61 }
  0xe0   :  { %1032 = vmatmul.f32.gmra.mxu3 %v352_v19  ;;  %2194 = vmatpush.msra.mxu1 %v3602_v61  ;;  %v375_v19 = vsub.f32 %v128_v11, %v3600_v26 }
  0xe1   :  { %v3598_v14 = vadd.f32 %v931_v38, %v733_v59  ;;  %816 = vmatmul.f32.gmra.mxu2 %v351_v23  ;;  %v369_v38 = vsub.f32 %v367_v42, %v368_v8  ;;  %v4497_v23 = vand.u32 4294901760, %v3606_v5  ;;  %1999 = vmatpush.msra.mxu0 %v3606_v5 }
  0xe3   :  { %4642 = vst [vmem:[#allocation34_spill] sm:$0xff] %v3598_v14  ;;  %v236_v29 = vpop.f32.mrf.mxu0  ;;  %v1814_v43 = vsub.f32 %v3606_v5, %v4497_v23 }
  0xe4   :  { %v553_v2 = vpop.f32.mrf.mxu1  ;;  %v737_v21 = vpop.f32.mrf.mxu2 }
  0xe5   :  { %v554_v34 = vadd.f32 %v553_v2, %v228_v45  ;;  %v937_v39 = vpop.f32.mrf.mxu3  ;;  %v370_v2 = vand.u32 4294901760, %v369_v38  ;;  %v63_v38 = vld [vmem:[#allocation6 + $0x88] sm:$0xff] }
  0xe6   :  { %363 = vmatmul.f32.gmra.mxu0 %v362_v56  ;;  %v376_v56 = vand.u32 4294901760, %v375_v19 }
  0xe7   :  { %v738_v59 = vadd.f32 %v737_v21, %v554_v34  ;;  %616 = vmatmul.f32.gmra.mxu1 %v3570_v44  ;;  %v3618_v34 = vand.u32 4294901760, %v130_v1  ;;  %v1815_v21 = vand.u32 4294901760, %v1814_v43 }
  0xe8   :  { %1038 = vmatmul.f32.gmra.mxu3 %v360_v33  ;;  %v377_v33 = vsub.f32 %v375_v19, %v376_v56 }
  0xe9   :  { %v3613_v45 = vadd.f32 %v937_v39, %v738_v59  ;;  %821 = vmatmul.f32.gmra.mxu2 %v359_v18  ;;  %4644 = vst [vmem:[#allocation36_spill] sm:$0xff] %v3618_v34  ;;  %1816 = vmatpush.msrb.mxu3 %v1815_v21  ;;  %v383_v39 = vsub.f32 %v130_v1, %v3618_v34  ;;  %v132_v59 = vld [vmem:[#allocation3 + $0x1b0] sm:$0xff] }
  0xea   :  { %v378_v43 = vand.u32 4294901760, %v377_v33  ;;  %v134_v33 = vld [vmem:[#allocation3 + $0x1c0] sm:$0xff] }
  0xeb   :  { %4643 = vst [vmem:[#allocation35_spill] sm:$0xff] %v3613_v45  ;;  %v244_v44 = vpop.f32.mrf.mxu0  ;;  %v384_v23 = vand.u32 4294901760, %v383_v39  ;;  %v3624_v45 = vand.u32 4294901760, %v132_v59 }
  0xec   :  { %v557_v11 = vpop.f32.mrf.mxu1  ;;  %v742_v60 = vpop.f32.mrf.mxu2 }
  0xed   :  { %v558_v14 = vadd.f32 %v557_v11, %v236_v29  ;;  %v943_v28 = vpop.f32.mrf.mxu3  ;;  %v3626_v29 = vand.u32 4294901760, %v63_v38 }
  0xee   :  { %371 = vmatmul.f32.gmra.mxu0 %v370_v2 }
  0xef   :  { %v743_v54 = vadd.f32 %v742_v60, %v558_v14  ;;  %620 = vmatmul.f32.gmra.mxu1 %v3576_v20  ;;  %1473 = vmatpush.msrb.mxu2 %v3626_v29  ;;  %v3630_v1 = vsub.f32 %v63_v38, %v3626_v29 }
  0xf0   :  { %1044 = vmatmul.f32.gmra.mxu3 %v368_v8  ;;  %2196 = vmatpush.msra.mxu1 %v3626_v29  ;;  %v391_v8 = vsub.f32 %v132_v59, %v3624_v45 }
  0xf1   :  { %v3622_v18 = vadd.f32 %v943_v28, %v743_v54  ;;  %826 = vmatmul.f32.gmra.mxu2 %v367_v42  ;;  %v385_v28 = vsub.f32 %v383_v39, %v384_v23  ;;  %v4506_v42 = vand.u32 4294901760, %v3630_v1  ;;  %2002 = vmatpush.msra.mxu0 %v3630_v1 }
  0xf3   :  { %4645 = vst [vmem:[#allocation37_spill] sm:$0xff] %v3622_v18  ;;  %v252_v21 = vpop.f32.mrf.mxu0  ;;  %v1820_v38 = vsub.f32 %v3630_v1, %v4506_v42 }
  0xf4   :  { %v561_v60 = vpop.f32.mrf.mxu1  ;;  %v747_v2 = vpop.f32.mrf.mxu2 }
  0xf5   :  { %v562_v14 = vadd.f32 %v561_v60, %v244_v44  ;;  %v949_v11 = vpop.f32.mrf.mxu3  ;;  %v386_v60 = vand.u32 4294901760, %v385_v28  ;;  %v62_v28 = vld [vmem:[#allocation6 + $0x80] sm:$0xff] }
  0xf6   :  { %379 = vmatmul.f32.gmra.mxu0 %v378_v43  ;;  %v392_v43 = vand.u32 4294901760, %v391_v8 }
  0xf7   :  { %v748_v54 = vadd.f32 %v747_v2, %v562_v14  ;;  %624 = vmatmul.f32.gmra.mxu1 %v3594_v40  ;;  %v3642_v14 = vand.u32 4294901760, %v134_v33  ;;  %v1821_v2 = vand.u32 4294901760, %v1820_v38 }
  0xf8   :  { %1050 = vmatmul.f32.gmra.mxu3 %v376_v56  ;;  %v393_v56 = vsub.f32 %v391_v8, %v392_v43 }
  0xf9   :  { %v3637_v44 = vadd.f32 %v949_v11, %v748_v54  ;;  %831 = vmatmul.f32.gmra.mxu2 %v375_v19  ;;  %1822 = vmatpush.msrb.mxu3 %v1821_v2  ;;  %v399_v11 = vsub.f32 %v134_v33, %v3642_v14  ;;  %v136_v54 = vld [vmem:[#allocation3 + $0x1d0] sm:$0xff] }
  0xfa   :  { %v394_v38 = vand.u32 4294901760, %v393_v56  ;;  %v138_v56 = vld [vmem:[#allocation3 + $0x1e0] sm:$0xff] }
  0xfb   :  { %4646 = vst [vmem:[#allocation38_spill] sm:$0xff] %v3637_v44  ;;  %v260_v40 = vpop.f32.mrf.mxu0  ;;  %v400_v42 = vand.u32 4294901760, %v399_v11  ;;  %v3648_v44 = vand.u32 4294901760, %v136_v54 }
  0xfc   :  { %v565_v59 = vpop.f32.mrf.mxu1  ;;  %v752_v20 = vpop.f32.mrf.mxu2 }
  0xfd   :  { %v566_v18 = vadd.f32 %v565_v59, %v252_v21  ;;  %v955_v4 = vpop.f32.mrf.mxu3  ;;  %v3650_v21 = vand.u32 4294901760, %v62_v28 }
  0xfe   :  { %387 = vmatmul.f32.gmra.mxu0 %v386_v60 }
  0xff   :  { %v753_v22 = vadd.f32 %v752_v20, %v566_v18  ;;  %628 = vmatmul.f32.gmra.mxu1 %v3600_v26  ;;  %1475 = vmatpush.msrb.mxu2 %v3650_v21  ;;  %v3654_v33 = vsub.f32 %v62_v28, %v3650_v21 }
 0x100   :  { %1056 = vmatmul.f32.gmra.mxu3 %v384_v23  ;;  %2198 = vmatpush.msra.mxu1 %v3650_v21  ;;  %v401_v23 = vsub.f32 %v399_v11, %v400_v42 }
 0x101   :  { %v3646_v19 = vadd.f32 %v955_v4, %v753_v22  ;;  %836 = vmatmul.f32.gmra.mxu2 %v383_v39  ;;  %v4648_v22 = vand.u32 4294901760, %v3249_v57  ;;  %v407_v39 = vsub.f32 %v136_v54, %v3648_v44  ;;  %2005 = vmatpush.msra.mxu0 %v3654_v33 }
 0x103   :  { %4647 = vst [vmem:[#allocation39_spill] sm:$0xff] %v3646_v19  ;;  %v268_v2 = vpop.f32.mrf.mxu0  ;;  %2395 = vmatpush.msra.mxu2 %v4648_v22  ;;  %v4650_v22 = vand.u32 4294901760, %v3324_v30  ;;  %v140_v30 = vld [vmem:[#allocation3 + $0x1f0] sm:$0xff] }
 0x104   :  { %v569_v20 = vpop.f32.mrf.mxu1  ;;  %v757_v60 = vpop.f32.mrf.mxu2 }
 0x105   :  { %v570_v18 = vadd.f32 %v569_v20, %v260_v40  ;;  %v961_v59 = vpop.f32.mrf.mxu3  ;;  %v1825_v40 = vand.u32 4294901760, %v3654_v33  ;;  %v4649_v20 = vand.u32 4294901760, %v3264_v63 }
 0x106   :  { %395 = vmatmul.f32.gmra.mxu0 %v394_v38  ;;  %v402_v38 = vand.u32 4294901760, %v401_v23 }
 0x107   :  { %v758_v4 = vadd.f32 %v757_v60, %v570_v18  ;;  %632 = vmatmul.f32.gmra.mxu1 %v3618_v34  ;;  %2399 = vmatpush.msra.mxu2 %v4649_v20  ;;  %v1826_v57 = vsub.f32 %v3654_v33, %v1825_v40  ;;  %v408_v18 = vand.u32 4294901760, %v407_v39  ;;  %v3670_v60 = vand.u32 4294901760, %v138_v56 }
 0x108   :  { %1062 = vmatmul.f32.gmra.mxu3 %v392_v43  ;;  %v4651_v43 = vand.u32 4294901760, %v3361_v10 }
 0x109   :  { %v3665_v28 = vadd.f32 %v961_v59, %v758_v4  ;;  %841 = vmatmul.f32.gmra.mxu2 %v391_v8  ;;  %v1827_v54 = vand.u32 4294901760, %v1826_v57  ;;  %v409_v4 = vsub.f32 %v407_v39, %v408_v18  ;;  %v415_v23 = vsub.f32 %v138_v56, %v3670_v60 }
 0x10a   :  { %2403 = vmatpush.msra.mxu2 %v4650_v22  ;;  %v4654_v22 = vand.u32 4294901760, %v3454_v37 }
 0x10b   :  { %v276_v63 = vpop.f32.mrf.mxu0  ;;  %1828 = vmatpush.msrb.mxu3 %v1827_v54  ;;  %v416_v10 = vand.u32 4294901760, %v415_v23 }
 0x10c   :  { %v573_v20 = vpop.f32.mrf.mxu1  ;;  %v762_v19 = vpop.f32.mrf.mxu2  ;;  %2407 = vmatpush.msra.mxu2 %v4651_v43 }
 0x10d   :  { %v574_v34 = vadd.f32 %v573_v20, %v268_v2  ;;  %v967_v59 = vpop.f32.mrf.mxu3  ;;  %2586 = vmatpush.msra.mxu3 %v3221_v31  ;;  %v4652_v2 = vand.u32 4294901760, %v3400_v51  ;;  %v410_v31 = vand.u32 4294901760, %v409_v4  ;;  %v4656_v20 = vand.u32 4294901760, %v3494_v35 }
 0x10e   :  { %403 = vmatmul.f32.gmra.mxu0 %v402_v38  ;;  %v4657_v4 = vand.u32 4294901760, %v3514_v36 }
 0x10f   :  { %v763_v8 = vadd.f32 %v762_v19, %v574_v34  ;;  %636 = vmatmul.f32.gmra.mxu1 %v3624_v45  ;;  %2588 = vmatpush.msra.mxu3 %v3251_v58  ;;  %v3685_v34 = vand.u32 4294901760, %v140_v30  ;;  %v4653_v19 = vand.u32 4294901760, %v3434_v24 }
 0x110   :  { %2411 = vmatpush.msra.mxu2 %v4652_v2  ;;  %1068 = vmatmul.f32.gmra.mxu3 %v400_v42  ;;  %v417_v42 = vsub.f32 %v415_v23, %v416_v10  ;;  %v4659_v2 = vand.u32 4294901760, %v3558_v55  ;;  %v4661_v55 = vand.u32 4294901760, %v3606_v5 }
 0x111   :  { %v3682_v57 = vadd.f32 %v967_v59, %v763_v8  ;;  %846 = vmatmul.f32.gmra.mxu2 %v399_v11  ;;  %2590 = vmatpush.msra.mxu3 %v3318_v62  ;;  %v423_v24 = vsub.f32 %v140_v30, %v3685_v34  ;;  %v4655_v11 = vand.u32 4294901760, %v3474_v15  ;;  %v81_v30 = vld [vmem:[#allocation3 + $0x18] sm:$0xff] }
 0x112   :  { %2415 = vmatpush.msra.mxu2 %v4653_v19  ;;  %v418_v37 = vand.u32 4294901760, %v417_v42 }
 0x113   :  { %v284_v56 = vpop.f32.mrf.mxu0  ;;  %2592 = vmatpush.msra.mxu3 %v3354_v27 }
 0x114   :  { %v577_v38 = vpop.f32.mrf.mxu1  ;;  %v767_v51 = vpop.f32.mrf.mxu2  ;;  %2419 = vmatpush.msra.mxu2 %v4654_v22 }
 0x115   :  { %v578_v58 = vadd.f32 %v577_v38, %v276_v63  ;;  %v973_v54 = vpop.f32.mrf.mxu3  ;;  %2594 = vmatpush.msra.mxu3 %v3393_v46  ;;  %v424_v46 = vand.u32 4294901760, %v423_v24  ;;  %v79_v63 = vld [vmem:[#allocation3 + $0x8] sm:$0xff]  ;;  %v3725_v38 = vand.u32 4294901760, %v81_v30 }
 0x116   :  { %411 = vmatmul.f32.gmra.mxu0 %v410_v31  ;;  %2423 = vmatpush.msra.mxu2 %v4655_v11 }
 0x117   :  { %v768_v62 = vadd.f32 %v767_v51, %v578_v58  ;;  %640 = vmatmul.f32.gmra.mxu1 %v3642_v14  ;;  %2596 = vmatpush.msra.mxu3 %v3429_v16  ;;  %v425_v35 = vsub.f32 %v423_v24, %v424_v46  ;;  %v3738_v58 = vsub.f32 %v81_v30, %v3725_v38  ;;  %v4662_v51 = vand.u32 4294901760, %v3630_v1 }
 0x118   :  { %1074 = vmatmul.f32.gmra.mxu3 %v408_v18  ;;  %2427 = vmatpush.msra.mxu2 %v4656_v20  ;;  %v3706_v18 = vand.u32 4294901760, %v79_v63 }
 0x119   :  { %v3698_v27 = vadd.f32 %v973_v54, %v768_v62  ;;  %851 = vmatmul.f32.gmra.mxu2 %v407_v39  ;;  %2598 = vmatpush.msra.mxu3 %v3450_v48  ;;  %v4658_v39 = vand.u32 4294901760, %v3534_v3 }
 0x11a   :  { %2431 = vmatpush.msra.mxu2 %v4657_v4  ;;  %v3716_v36 = vsub.f32 %v79_v63, %v3706_v18 }
 0x11b   :  { %v292_v59 = vpop.f32.mrf.mxu0  ;;  %2600 = vmatpush.msra.mxu3 %v3470_v7 }
 0x11c   :  { %v581_v43 = vpop.f32.mrf.mxu1  ;;  %v772_v8 = vpop.f32.mrf.mxu2  ;;  %2435 = vmatpush.msra.mxu2 %v4658_v39  ;;  %v87_v39 = vld [vmem:[#allocation3 + $0x48] sm:$0xff] }
 0x11d   :  { %v582_v16 = vadd.f32 %v581_v43, %v284_v56  ;;  %v979_v15 = vpop.f32.mrf.mxu3  ;;  %2602 = vmatpush.msra.mxu3 %v3490_v13  ;;  %v426_v13 = vand.u32 4294901760, %v425_v35 }
 0x11e   :  { %419 = vmatmul.f32.gmra.mxu0 %v418_v37  ;;  %2439 = vmatpush.msra.mxu2 %v4659_v2 }
 0x11f   :  { %v773_v48 = vadd.f32 %v772_v8, %v582_v16  ;;  %644 = vmatmul.f32.gmra.mxu1 %v3648_v44  ;;  %2604 = vmatpush.msra.mxu3 %v3510_v49 }
 0x120   :  { %1080 = vmatmul.f32.gmra.mxu3 %v416_v10  ;;  %v4660_v10 = vand.u32 4294901760, %v3582_v41 }
 0x121   :  { %v3713_v7 = vadd.f32 %v979_v15, %v773_v48  ;;  %856 = vmatmul.f32.gmra.mxu2 %v415_v23  ;;  %2606 = vmatpush.msra.mxu3 %v3530_v17  ;;  %v4519_v23 = vand.u32 4294901760, %v3716_v36 }
 0x122   :  { %2443 = vmatpush.msra.mxu2 %v4660_v10 }
 0x123   :  { %v300_v31 = vpop.f32.mrf.mxu0  ;;  %2608 = vmatpush.msra.mxu3 %v3554_v25  ;;  %v1479_v41 = vsub.f32 %v3716_v36, %v4519_v23 }
 0x124   :  { %v585_v19 = vpop.f32.mrf.mxu1  ;;  %v777_v49 = vpop.f32.mrf.mxu2  ;;  %2447 = vmatpush.msra.mxu2 %v4661_v55 }
 0x125   :  { %v586_v3 = vadd.f32 %v585_v19, %v292_v59  ;;  %v985_v56 = vpop.f32.mrf.mxu3  ;;  %2610 = vmatpush.msra.mxu3 %v3578_v12  ;;  %v83_v12 = vld [vmem:[#allocation3 + $0x28] sm:$0xff]  ;;  %v1480_v42 = vand.u32 4294901760, %v1479_v41  ;;  %v89_v41 = vld [vmem:[#allocation3 + $0x58] sm:$0xff] }
 0x126   :  { %427 = vmatmul.f32.gmra.mxu0 %v426_v13  ;;  %2451 = vmatpush.msra.mxu2 %v4662_v51  ;;  %v3747_v11 = vand.u32 4294901760, %v83_v12 }
 0x127   :  { %v778_v17 = vadd.f32 %v777_v49, %v586_v3  ;;  %648 = vmatmul.f32.gmra.mxu1 %v3670_v60  ;;  %2612 = vmatpush.msra.mxu3 %v3602_v61  ;;  %v3775_v49 = vand.u32 4294901760, %v87_v39 }
 0x128   :  { %1086 = vmatmul.f32.gmra.mxu3 %v424_v46  ;;  %2455 = vmatpush.msra.mxu2 %v1825_v40  ;;  %v3758_v33 = vsub.f32 %v83_v12, %v3747_v11  ;;  %v85_v40 = vld [vmem:[#allocation3 + $0x38] sm:$0xff] }
 0x129   :  { %v3732_v25 = vadd.f32 %v985_v56, %v778_v17  ;;  %861 = vmatmul.f32.gmra.mxu2 %v423_v24  ;;  %2614 = vmatpush.msra.mxu3 %v3626_v29  ;;  %v4518_v24 = vand.u32 4294901760, %v3738_v58  ;;  %v3761_v8 = vand.u32 4294901760, %v85_v40  ;;  %v3786_v55 = vsub.f32 %v87_v39, %v3775_v49 }
 0x12a   :  { %v4517_v16 = vand.u32 4294901760, %v3758_v33 }
 0x12b   :  { %v308_v5 = vpop.f32.mrf.mxu0  ;;  %2616 = vmatpush.msra.mxu3 %v3650_v21  ;;  %v1487_v21 = vsub.f32 %v3738_v58, %v4518_v24  ;;  %v3772_v35 = vsub.f32 %v85_v40, %v3761_v8 }
 0x12c   :  { %v589_v54 = vpop.f32.mrf.mxu1  ;;  %v782_v22 = vpop.f32.mrf.mxu2  ;;  %v1495_v48 = vsub.f32 %v3758_v33, %v4517_v16 }
 0x12d   :  { %v590_v61 = vadd.f32 %v589_v54, %v300_v31  ;;  %v991_v62 = vpop.f32.mrf.mxu3  ;;  %v1488_v43 = vand.u32 4294901760, %v1487_v21 }
 0x12e   :  { %1155 = vmatmul.f32.vlgmr.msrb.gmra.mxu0 %v3204_v6  ;;  %v1496_v3 = vand.u32 4294901760, %v1495_v48 }
 0x12f   :  { %v783_v29 = vadd.f32 %v782_v22, %v590_v61  ;;  %652 = vmatmul.f32.gmra.mxu1 %v3685_v34 }
 0x130   :  { %1830 = vmatmul.f32.vlgmr.msrb.gmra.mxu3 %v3706_v18 }
 0x131   :  { %v3751_v1 = vadd.f32 %v991_v62, %v783_v29  ;;  %1481 = vmatmul.f32.vlgmr.msrb.gmra.mxu2 %v1480_v42  ;;  %v3789_v62 = vand.u32 4294901760, %v89_v41 }
 0x133   :  { %v316_v37 = vpop.f32.mrf.mxu0  ;;  %v3800_v40 = vsub.f32 %v89_v41, %v3789_v62 }
 0x134   :  { %v593_v46 = vpop.f32.mrf.mxu1  ;;  %v787_v20 = vpop.f32.mrf.mxu2 }
 0x135   :  { %v594_v63 = vadd.f32 %v593_v46, %v308_v5  ;;  %v997_v59 = vpop.f32.mrf.mxu3 }
 0x136   :  { %1159 = vmatmul.f32.gmra.mxu0 %v3241_v50 }
 0x137   :  { %v788_v15 = vadd.f32 %v787_v20, %v594_v63  ;;  %1316 = vmatmul.f32.vlgmr.msrb.gmra.mxu1 %v3204_v6  ;;  %v4515_v6 = vand.u32 4294901760, %v3772_v35 }
 0x138   :  { %1834 = vmatmul.f32.gmra.mxu3 %v3725_v38 }
 0x139   :  { %v3765_v4 = vadd.f32 %v997_v59, %v788_v15  ;;  %1489 = vmatmul.f32.gmra.mxu2 %v1488_v43  ;;  %v1503_v17 = vsub.f32 %v3772_v35, %v4515_v6 }
 0x13b   :  { %v324_v13 = vpop.f32.mrf.mxu0  ;;  %v1504_v22 = vand.u32 4294901760, %v1503_v17 }
 0x13c   :  { %v597_v30 = vpop.f32.mrf.mxu1  ;;  %v792_v31 = vpop.f32.mrf.mxu2 }
 0x13d   :  { %v598_v2 = vadd.f32 %v597_v30, %v316_v37  ;;  %v1003_v19 = vpop.f32.mrf.mxu3  ;;  %v91_v37 = vld [vmem:[#allocation3 + $0x68] sm:$0xff] }
 0x13e   :  { %1163 = vmatmul.f32.gmra.mxu0 %v3289_v52  ;;  %v3803_v48 = vand.u32 4294901760, %v91_v37 }
 0x13f   :  { %v793_v56 = vadd.f32 %v792_v31, %v598_v2  ;;  %1320 = vmatmul.f32.gmra.mxu1 %v3241_v50  ;;  %v4514_v50 = vand.u32 4294901760, %v3786_v55  ;;  %v93_v31 = vld [vmem:[#allocation3 + $0x78] sm:$0xff] }
 0x140   :  { %1838 = vmatmul.f32.gmra.mxu3 %v3747_v11  ;;  %v3814_v2 = vsub.f32 %v91_v37, %v3803_v48 }
 0x141   :  { %v3779_v10 = vadd.f32 %v1003_v19, %v793_v56  ;;  %1497 = vmatmul.f32.gmra.mxu2 %v1496_v3  ;;  %v1511_v21 = vsub.f32 %v3786_v55, %v4514_v50 }
 0x143   :  { %v332_v12 = vpop.f32.mrf.mxu0  ;;  %v1512_v15 = vand.u32 4294901760, %v1511_v21 }
 0x144   :  { %v601_v51 = vpop.f32.mrf.mxu1  ;;  %v797_v54 = vpop.f32.mrf.mxu2 }
 0x145   :  { %v602_v5 = vadd.f32 %v601_v51, %v324_v13  ;;  %v1009_v61 = vpop.f32.mrf.mxu3  ;;  %v3817_v51 = vand.u32 4294901760, %v93_v31 }
 0x146   :  { %1167 = vmatmul.f32.gmra.mxu0 %v3316_v0 }
 0x147   :  { %v798_v42 = vadd.f32 %v797_v54, %v602_v5  ;;  %1324 = vmatmul.f32.gmra.mxu1 %v3289_v52  ;;  %v4513_v52 = vand.u32 4294901760, %v3800_v40 }
 0x148   :  { %1842 = vmatmul.f32.gmra.mxu3 %v3761_v8 }
 0x149   :  { %v3793_v29 = vadd.f32 %v1009_v61, %v798_v42  ;;  %1505 = vmatmul.f32.gmra.mxu2 %v1504_v22  ;;  %v1519_v30 = vsub.f32 %v3800_v40, %v4513_v52  ;;  %v3828_v22 = vsub.f32 %v93_v31, %v3817_v51  ;;  %v95_v42 = vld [vmem:[#allocation3 + $0x88] sm:$0xff] }
 0x14b   :  { %v340_v46 = vpop.f32.mrf.mxu0 }
 0x14c   :  { %v605_v63 = vpop.f32.mrf.mxu1  ;;  %v802_v59 = vpop.f32.mrf.mxu2 }
 0x14d   :  { %v606_v20 = vadd.f32 %v605_v63, %v332_v12  ;;  %v1015_v43 = vpop.f32.mrf.mxu3  ;;  %v1520_v12 = vand.u32 4294901760, %v1519_v30 }
 0x14e   :  { %1171 = vmatmul.f32.gmra.mxu0 %v3338_v53 }
 0x14f   :  { %v803_v39 = vadd.f32 %v802_v59, %v606_v20  ;;  %1328 = vmatmul.f32.gmra.mxu1 %v3316_v0  ;;  %v4511_v0 = vand.u32 4294901760, %v3814_v2 }
 0x150   :  { %1846 = vmatmul.f32.gmra.mxu3 %v3775_v49 }
 0x151   :  { %v3807_v13 = vadd.f32 %v1015_v43, %v803_v39  ;;  %1513 = vmatmul.f32.gmra.mxu2 %v1512_v15  ;;  %v1527_v61 = vsub.f32 %v3814_v2, %v4511_v0  ;;  %v3831_v43 = vand.u32 4294901760, %v95_v42 }
 0x153   :  { %v348_v19 = vpop.f32.mrf.mxu0  ;;  %v1528_v59 = vand.u32 4294901760, %v1527_v61  ;;  %v3842_v31 = vsub.f32 %v95_v42, %v3831_v43 }
 0x154   :  { %v609_v3 = vpop.f32.mrf.mxu1  ;;  %v807_v17 = vpop.f32.mrf.mxu2 }
 0x155   :  { %v610_v56 = vadd.f32 %v609_v3, %v340_v46  ;;  %v1021_v41 = vpop.f32.mrf.mxu3 }
 0x156   :  { %1175 = vmatmul.f32.gmra.mxu0 %v3352_v9 }
 0x157   :  { %v808_v5 = vadd.f32 %v807_v17, %v610_v56  ;;  %1332 = vmatmul.f32.gmra.mxu1 %v3338_v53  ;;  %v4510_v53 = vand.u32 4294901760, %v3828_v22 }
 0x158   :  { %1850 = vmatmul.f32.gmra.mxu3 %v3789_v62 }
 0x159   :  { %v3821_v54 = vadd.f32 %v1021_v41, %v808_v5  ;;  %1521 = vmatmul.f32.gmra.mxu2 %v1520_v12  ;;  %v1535_v30 = vsub.f32 %v3828_v22, %v4510_v53 }
 0x15b   :  { %v356_v21 = vpop.f32.mrf.mxu0  ;;  %v1536_v5 = vand.u32 4294901760, %v1535_v30 }
 0x15c   :  { %v613_v37 = vpop.f32.mrf.mxu1  ;;  %v812_v63 = vpop.f32.mrf.mxu2 }
 0x15d   :  { %v614_v46 = vadd.f32 %v613_v37, %v348_v19  ;;  %v1027_v20 = vpop.f32.mrf.mxu3  ;;  %v97_v19 = vld [vmem:[#allocation3 + $0x98] sm:$0xff] }
 0x15e   :  { %1179 = vmatmul.f32.gmra.mxu0 %v3377_v47  ;;  %v3845_v61 = vand.u32 4294901760, %v97_v19 }
 0x15f   :  { %v813_v15 = vadd.f32 %v812_v63, %v614_v46  ;;  %1336 = vmatmul.f32.gmra.mxu1 %v3352_v9  ;;  %v4509_v9 = vand.u32 4294901760, %v3842_v31  ;;  %v99_v63 = vld [vmem:[#allocation3 + $0xa8] sm:$0xff] }
 0x160   :  { %1854 = vmatmul.f32.gmra.mxu3 %v3803_v48 }
 0x161   :  { %v3835_v39 = vadd.f32 %v1027_v20, %v813_v15  ;;  %1529 = vmatmul.f32.gmra.mxu2 %v1528_v59  ;;  %v1543_v42 = vsub.f32 %v3842_v31, %v4509_v9 }
 0x163   :  { %v364_v3 = vpop.f32.mrf.mxu0 }
 0x164   :  { %v617_v56 = vpop.f32.mrf.mxu1  ;;  %v817_v41 = vpop.f32.mrf.mxu2 }
 0x165   :  { %v618_v17 = vadd.f32 %v617_v56, %v356_v21  ;;  %v1033_v12 = vpop.f32.mrf.mxu3  ;;  %v3856_v21 = vsub.f32 %v97_v19, %v3845_v61 }
 0x166   :  { %1183 = vmatmul.f32.gmra.mxu0 %v3391_v32 }
 0x167   :  { %v818_v37 = vadd.f32 %v817_v41, %v618_v17  ;;  %1340 = vmatmul.f32.gmra.mxu1 %v3377_v47  ;;  %v1544_v17 = vand.u32 4294901760, %v1543_v42  ;;  %v4512_v47 = vand.u32 4294901760, %v3856_v21  ;;  %v3859_v41 = vand.u32 4294901760, %v99_v63  ;;  %v101_v42 = vld [vmem:[#allocation3 + $0xb8] sm:$0xff] }
 0x168   :  { %1858 = vmatmul.f32.gmra.mxu3 %v3817_v51 }
 0x169   :  { %v3849_v46 = vadd.f32 %v1033_v12, %v818_v37  ;;  %1537 = vmatmul.f32.gmra.mxu2 %v1536_v5  ;;  %4663 = vst [vmem:[#allocation40_spill] sm:$0xff] %v3859_v41  ;;  %v4664_v5 = vld [vmem:[#allocation12_spill] sm:$0xff]  ;;  %v1551_v19 = vsub.f32 %v3856_v21, %v4512_v47 }
 0x16b   :  { %v372_v20 = vpop.f32.mrf.mxu0  ;;  %v1552_v0 = vand.u32 4294901760, %v1551_v19 }
 0x16c   :  { %v621_v59 = vpop.f32.mrf.mxu1  ;;  %v822_v30 = vpop.f32.mrf.mxu2 }
 0x16d   :  { %v622_v15 = vadd.f32 %v621_v59, %v364_v3  ;;  %v1039_v56 = vpop.f32.mrf.mxu3  ;;  %v3870_v3 = vsub.f32 %v99_v63, %v3859_v41 }
 0x16e   :  { %1187 = vmatmul.f32.gmra.mxu0 %v4664_v5 }
 0x16f   :  { %v823_v12 = vadd.f32 %v822_v30, %v622_v15  ;;  %1344 = vmatmul.f32.gmra.mxu1 %v3391_v32  ;;  %4665 = vst [vmem:[#allocation12_spill] sm:$0xff] %v3870_v3  ;;  %v4516_v32 = vand.u32 4294901760, %v3870_v3 }
 0x170   :  { %1862 = vmatmul.f32.gmra.mxu3 %v3831_v43 }
 0x171   :  { %v3863_v37 = vadd.f32 %v1039_v56, %v823_v12  ;;  %1545 = vmatmul.f32.gmra.mxu2 %v1544_v17  ;;  %v3873_v56 = vand.u32 4294901760, %v101_v42  ;;  %v4667_v17 = vld [vmem:[#allocation13_spill] sm:$0xff] }
 0x173   :  { %v380_v59 = vpop.f32.mrf.mxu0  ;;  %4666 = vst [vmem:[#allocation41_spill] sm:$0xff] %v3873_v56  ;;  %v3884_v63 = vsub.f32 %v101_v42, %v3873_v56 }
 0x174   :  { %v625_v9 = vpop.f32.mrf.mxu1  ;;  %v827_v30 = vpop.f32.mrf.mxu2 }
 0x175   :  { %v626_v15 = vadd.f32 %v625_v9, %v372_v20  ;;  %v1045_v53 = vpop.f32.mrf.mxu3  ;;  %v1559_v9 = vsub.f32 %v3870_v3, %v4516_v32  ;;  %4668 = vst [vmem:[#allocation13_spill] sm:$0xff] %v3884_v63  ;;  %v103_v20 = vld [vmem:[#allocation3 + $0xc8] sm:$0xff] }
 0x176   :  { %1191 = vmatmul.f32.gmra.mxu0 %v4667_v17 }
 0x177   :  { %v828_v12 = vadd.f32 %v827_v30, %v626_v15  ;;  %1348 = vmatmul.f32.gmra.mxu1 %v4664_v5  ;;  %v1560_v6 = vand.u32 4294901760, %v1559_v9  ;;  %v3887_v5 = vand.u32 4294901760, %v103_v20 }
 0x178   :  { %1866 = vmatmul.f32.gmra.mxu3 %v3845_v61 }
 0x179   :  { %v3877_v47 = vadd.f32 %v1045_v53, %v828_v12  ;;  %1553 = vmatmul.f32.gmra.mxu2 %v1552_v0  ;;  %v4520_v53 = vand.u32 4294901760, %v3884_v63  ;;  %4669 = vst [vmem:[#allocation42_spill] sm:$0xff] %v3887_v5  ;;  %v4670_v0 = vld [vmem:[#allocation14_spill] sm:$0xff]  ;;  %v3898_v42 = vsub.f32 %v103_v20, %v3887_v5 }
 0x17b   :  { %v388_v19 = vpop.f32.mrf.mxu0  ;;  %4671 = vst [vmem:[#allocation14_spill] sm:$0xff] %v3898_v42 }
 0x17c   :  { %v629_v52 = vpop.f32.mrf.mxu1  ;;  %v832_v30 = vpop.f32.mrf.mxu2 }
 0x17d   :  { %v630_v15 = vadd.f32 %v629_v52, %v380_v59  ;;  %v1051_v50 = vpop.f32.mrf.mxu3  ;;  %v1567_v52 = vsub.f32 %v3884_v63, %v4520_v53  ;;  %v105_v59 = vld [vmem:[#allocation3 + $0xd8] sm:$0xff] }
 0x17e   :  { %1195 = vmatmul.f32.gmra.mxu0 %v4670_v0 }
 0x17f   :  { %v833_v12 = vadd.f32 %v832_v30, %v630_v15  ;;  %1352 = vmatmul.f32.gmra.mxu1 %v4667_v17  ;;  %v1568_v23 = vand.u32 4294901760, %v1567_v52  ;;  %v3901_v17 = vand.u32 4294901760, %v105_v59 }
 0x180   :  { %1870 = vmatmul.f32.gmra.mxu3 %v3859_v41 }
 0x181   :  { %v3891_v32 = vadd.f32 %v1051_v50, %v833_v12  ;;  %1561 = vmatmul.f32.gmra.mxu2 %v1560_v6  ;;  %v4527_v50 = vand.u32 4294901760, %v3898_v42  ;;  %4672 = vst [vmem:[#allocation43_spill] sm:$0xff] %v3901_v17  ;;  %v4673_v6 = vld [vmem:[#allocation15_spill] sm:$0xff]  ;;  %v3912_v20 = vsub.f32 %v105_v59, %v3901_v17 }
 0x183   :  { %v396_v9 = vpop.f32.mrf.mxu0  ;;  %4675 = vst [vmem:[#allocation44_spill] sm:$0xff] %v3912_v20 }
 0x184   :  { %v633_v16 = vpop.f32.mrf.mxu1  ;;  %v837_v30 = vpop.f32.mrf.mxu2 }
 0x185   :  { %v634_v15 = vadd.f32 %v633_v16, %v388_v19  ;;  %v1057_v24 = vpop.f32.mrf.mxu3  ;;  %v1575_v16 = vsub.f32 %v3898_v42, %v4527_v50  ;;  %v107_v19 = vld [vmem:[#allocation3 + $0xe8] sm:$0xff] }
 0x186   :  { %1199 = vmatmul.f32.gmra.mxu0 %v4673_v6 }
 0x187   :  { %v838_v12 = vadd.f32 %v837_v30, %v634_v15  ;;  %1356 = vmatmul.f32.gmra.mxu1 %v4670_v0  ;;  %v1576_v3 = vand.u32 4294901760, %v1575_v16  ;;  %v3915_v0 = vand.u32 4294901760, %v107_v19 }
 0x188   :  { %1874 = vmatmul.f32.gmra.mxu3 %v3873_v56 }
 0x189   :  { %v3905_v53 = vadd.f32 %v1057_v24, %v838_v12  ;;  %1569 = vmatmul.f32.gmra.mxu2 %v1568_v23  ;;  %v4532_v24 = vand.u32 4294901760, %v3912_v20  ;;  %4676 = vst [vmem:[#allocation45_spill] sm:$0xff] %v3915_v0  ;;  %v4677_v23 = vld [vmem:[#allocation16_spill] sm:$0xff]  ;;  %v3926_v59 = vsub.f32 %v107_v19, %v3915_v0 }
 0x18b   :  { %4674 = vst [vmem:[#allocation15_spill] sm:$0xff] %v3905_v53  ;;  %v404_v52 = vpop.f32.mrf.mxu0 }
 0x18c   :  { %v637_v63 = vpop.f32.mrf.mxu1  ;;  %v842_v30 = vpop.f32.mrf.mxu2  ;;  %4679 = vst [vmem:[#allocation46_spill] sm:$0xff] %v3926_v59 }
 0x18d   :  { %v638_v15 = vadd.f32 %v637_v63, %v396_v9  ;;  %v1063_v41 = vpop.f32.mrf.mxu3  ;;  %v1583_v63 = vsub.f32 %v3912_v20, %v4532_v24  ;;  %v109_v9 = vld [vmem:[#allocation3 + $0xf8] sm:$0xff] }
 0x18e   :  { %1203 = vmatmul.f32.gmra.mxu0 %v4677_v23 }
 0x18f   :  { %v843_v12 = vadd.f32 %v842_v30, %v638_v15  ;;  %1360 = vmatmul.f32.gmra.mxu1 %v4673_v6  ;;  %v1584_v53 = vand.u32 4294901760, %v1583_v63  ;;  %v3929_v6 = vand.u32 4294901760, %v109_v9 }
 0x190   :  { %1878 = vmatmul.f32.gmra.mxu3 %v3887_v5 }
 0x191   :  { %v3919_v50 = vadd.f32 %v1063_v41, %v843_v12  ;;  %1577 = vmatmul.f32.gmra.mxu2 %v1576_v3  ;;  %v4537_v41 = vand.u32 4294901760, %v3926_v59  ;;  %4680 = vst [vmem:[#allocation47_spill] sm:$0xff] %v3929_v6  ;;  %v4681_v3 = vld [vmem:[#allocation17_spill] sm:$0xff]  ;;  %v3940_v19 = vsub.f32 %v109_v9, %v3929_v6 }
 0x193   :  { %4678 = vst [vmem:[#allocation16_spill] sm:$0xff] %v3919_v50  ;;  %v412_v16 = vpop.f32.mrf.mxu0 }
 0x194   :  { %v641_v42 = vpop.f32.mrf.mxu1  ;;  %v847_v30 = vpop.f32.mrf.mxu2  ;;  %4683 = vst [vmem:[#allocation48_spill] sm:$0xff] %v3940_v19 }
 0x195   :  { %v642_v15 = vadd.f32 %v641_v42, %v404_v52  ;;  %v1069_v56 = vpop.f32.mrf.mxu3  ;;  %v1591_v42 = vsub.f32 %v3926_v59, %v4537_v41  ;;  %v111_v52 = vld [vmem:[#allocation3 + $0x108] sm:$0xff] }
 0x196   :  { %1207 = vmatmul.f32.gmra.mxu0 %v4681_v3 }
 0x197   :  { %v848_v12 = vadd.f32 %v847_v30, %v642_v15  ;;  %1364 = vmatmul.f32.gmra.mxu1 %v4677_v23  ;;  %v1592_v50 = vand.u32 4294901760, %v1591_v42  ;;  %v3943_v23 = vand.u32 4294901760, %v111_v52 }
 0x198   :  { %1882 = vmatmul.f32.gmra.mxu3 %v3901_v17 }
 0x199   :  { %v3933_v24 = vadd.f32 %v1069_v56, %v848_v12  ;;  %1585 = vmatmul.f32.gmra.mxu2 %v1584_v53  ;;  %v4542_v56 = vand.u32 4294901760, %v3940_v19  ;;  %4684 = vst [vmem:[#allocation49_spill] sm:$0xff] %v3943_v23  ;;  %v4685_v53 = vld [vmem:[#allocation18_spill] sm:$0xff]  ;;  %v3954_v9 = vsub.f32 %v111_v52, %v3943_v23 }
 0x19b   :  { %4682 = vst [vmem:[#allocation17_spill] sm:$0xff] %v3933_v24  ;;  %v420_v63 = vpop.f32.mrf.mxu0 }
 0x19c   :  { %v645_v20 = vpop.f32.mrf.mxu1  ;;  %v852_v30 = vpop.f32.mrf.mxu2  ;;  %4687 = vst [vmem:[#allocation50_spill] sm:$0xff] %v3954_v9 }
 0x19d   :  { %v646_v15 = vadd.f32 %v645_v20, %v412_v16  ;;  %v1075_v5 = vpop.f32.mrf.mxu3  ;;  %v1599_v20 = vsub.f32 %v3940_v19, %v4542_v56  ;;  %v113_v16 = vld [vmem:[#allocation3 + $0x118] sm:$0xff] }
 0x19e   :  { %1211 = vmatmul.f32.gmra.mxu0 %v4685_v53 }
 0x19f   :  { %v853_v12 = vadd.f32 %v852_v30, %v646_v15  ;;  %1368 = vmatmul.f32.gmra.mxu1 %v4681_v3  ;;  %v1600_v24 = vand.u32 4294901760, %v1599_v20  ;;  %v3957_v3 = vand.u32 4294901760, %v113_v16 }
 0x1a0   :  { %1886 = vmatmul.f32.gmra.mxu3 %v3915_v0 }
 0x1a1   :  { %v3947_v41 = vadd.f32 %v1075_v5, %v853_v12  ;;  %1593 = vmatmul.f32.gmra.mxu2 %v1592_v50  ;;  %v4547_v5 = vand.u32 4294901760, %v3954_v9  ;;  %4688 = vst [vmem:[#allocation51_spill] sm:$0xff] %v3957_v3  ;;  %v4689_v50 = vld [vmem:[#allocation19_spill] sm:$0xff]  ;;  %v3968_v52 = vsub.f32 %v113_v16, %v3957_v3 }
 0x1a3   :  { %4686 = vst [vmem:[#allocation18_spill] sm:$0xff] %v3947_v41  ;;  %v428_v42 = vpop.f32.mrf.mxu0 }
 0x1a4   :  { %v649_v59 = vpop.f32.mrf.mxu1  ;;  %v857_v30 = vpop.f32.mrf.mxu2  ;;  %4691 = vst [vmem:[#allocation52_spill] sm:$0xff] %v3968_v52 }
 0x1a5   :  { %v650_v15 = vadd.f32 %v649_v59, %v420_v63  ;;  %v1081_v17 = vpop.f32.mrf.mxu3  ;;  %v1607_v59 = vsub.f32 %v3954_v9, %v4547_v5  ;;  %v115_v63 = vld [vmem:[#allocation3 + $0x128] sm:$0xff]  ;;  %v117_v9 = vld [vmem:[#allocation3 + $0x138] sm:$0xff] }
 0x1a6   :  { %1215 = vmatmul.f32.gmra.mxu0 %v4689_v50 }
 0x1a7   :  { %v858_v12 = vadd.f32 %v857_v30, %v650_v15  ;;  %1372 = vmatmul.f32.gmra.mxu1 %v4685_v53  ;;  %v1608_v41 = vand.u32 4294901760, %v1607_v59  ;;  %v3971_v53 = vand.u32 4294901760, %v115_v63  ;;  %v4696_v59 = vld [vmem:[#allocation24_spill] sm:$0xff] }
 0x1a8   :  { %1890 = vmatmul.f32.gmra.mxu3 %v3929_v6 }
 0x1a9   :  { %v3961_v56 = vadd.f32 %v1081_v17, %v858_v12  ;;  %1601 = vmatmul.f32.gmra.mxu2 %v1600_v24  ;;  %v4554_v17 = vand.u32 4294901760, %v3968_v52  ;;  %4692 = vst [vmem:[#allocation53_spill] sm:$0xff] %v3971_v53  ;;  %v4693_v24 = vld [vmem:[#allocation20_spill] sm:$0xff] }
 0x1ab   :  { %4690 = vst [vmem:[#allocation19_spill] sm:$0xff] %v3961_v56  ;;  %v1156_v19 = vpop.f32.mrf.mxu0  ;;  %v1615_v16 = vsub.f32 %v3968_v52, %v4554_v17 }
 0x1ac   :  { %v653_v20 = vpop.f32.mrf.mxu1  ;;  %v862_v30 = vpop.f32.mrf.mxu2 }
 0x1ad   :  { %v654_v15 = vadd.f32 %v653_v20, %v428_v42  ;;  %v1087_v0 = vpop.f32.mrf.mxu3  ;;  %v3982_v42 = vsub.f32 %v115_v63, %v3971_v53  ;;  %v1157_v20 = vadd.f32 %v1156_v19, %v4696_v59  ;;  %v4701_v59 = vld [vmem:[#allocation26_spill] sm:$0xff] }
 0x1ae   :  { %1219 = vmatmul.f32.gmra.mxu0 %v4693_v24 }
 0x1af   :  { %v863_v12 = vadd.f32 %v862_v30, %v654_v15  ;;  %1376 = vmatmul.f32.gmra.mxu1 %v4689_v50  ;;  %4695 = vst [vmem:[#allocation54_spill] sm:$0xff] %v3982_v42 }
 0x1b0   :  { %1894 = vmatmul.f32.gmra.mxu3 %v3943_v23  ;;  %v3986_v23 = vand.u32 4294901760, %v117_v9 }
 0x1b1   :  { %v3975_v5 = vadd.f32 %v1087_v0, %v863_v12  ;;  %1609 = vmatmul.f32.gmra.mxu2 %v1608_v41  ;;  %v1616_v0 = vand.u32 4294901760, %v1615_v16  ;;  %v4559_v12 = vand.u32 4294901760, %v3982_v42 }
 0x1b2   :  { %4697 = vst [vmem:[#allocation24_spill] sm:$0xff] %v3986_v23  ;;  %v3997_v16 = vsub.f32 %v117_v9, %v3986_v23 }
 0x1b3   :  { %4694 = vst [vmem:[#allocation20_spill] sm:$0xff] %v3975_v5  ;;  %v1160_v15 = vpop.f32.mrf.mxu0  ;;  %v4698_v5 = vld [vmem:[#allocation21_spill] sm:$0xff]  ;;  %v1623_v19 = vsub.f32 %v3982_v42, %v4559_v12 }
 0x1b4   :  { %v1317_v30 = vpop.f32.mrf.mxu1  ;;  %v1482_v56 = vpop.f32.mrf.mxu2  ;;  %4700 = vst [vmem:[#allocation55_spill] sm:$0xff] %v3997_v16 }
 0x1b5   :  { %v1318_v6 = vadd.f32 %v1317_v30, %v1157_v20  ;;  %v1831_v50 = vpop.f32.mrf.mxu3  ;;  %v1161_v20 = vadd.f32 %v1160_v15, %v4701_v59  ;;  %v119_v30 = vld [vmem:[#allocation3 + $0x148] sm:$0xff]  ;;  %v4706_v59 = vld [vmem:[#allocation28_spill] sm:$0xff] }
 0x1b6   :  { %1223 = vmatmul.f32.gmra.mxu0 %v4698_v5 }
 0x1b7   :  { %v1483_v41 = vadd.f32 %v1482_v56, %v1318_v6  ;;  %1380 = vmatmul.f32.gmra.mxu1 %v4693_v24 }
 0x1b8   :  { %1898 = vmatmul.f32.gmra.mxu3 %v3957_v3  ;;  %v4001_v3 = vand.u32 4294901760, %v119_v30 }
 0x1b9   :  { %v3990_v63 = vadd.f32 %v1831_v50, %v1483_v41  ;;  %1617 = vmatmul.f32.gmra.mxu2 %v1616_v0  ;;  %v1624_v50 = vand.u32 4294901760, %v1623_v19  ;;  %v4564_v41 = vand.u32 4294901760, %v3997_v16 }
 0x1ba   :  { %4702 = vst [vmem:[#allocation26_spill] sm:$0xff] %v4001_v3  ;;  %v4012_v19 = vsub.f32 %v119_v30, %v4001_v3 }
 0x1bb   :  { %4699 = vst [vmem:[#allocation21_spill] sm:$0xff] %v3990_v63  ;;  %v1164_v6 = vpop.f32.mrf.mxu0  ;;  %v4703_v63 = vld [vmem:[#allocation22_spill] sm:$0xff]  ;;  %v1631_v15 = vsub.f32 %v3997_v16, %v4564_v41 }
 0x1bc   :  { %v1321_v56 = vpop.f32.mrf.mxu1  ;;  %v1490_v52 = vpop.f32.mrf.mxu2  ;;  %4705 = vst [vmem:[#allocation56_spill] sm:$0xff] %v4012_v19 }
 0x1bd   :  { %v1322_v17 = vadd.f32 %v1321_v56, %v1161_v20  ;;  %v1835_v24 = vpop.f32.mrf.mxu3  ;;  %v1165_v20 = vadd.f32 %v1164_v6, %v4706_v59  ;;  %v121_v56 = vld [vmem:[#allocation3 + $0x158] sm:$0xff]  ;;  %v4711_v59 = vld [vmem:[#allocation30_spill] sm:$0xff] }
 0x1be   :  { %1227 = vmatmul.f32.gmra.mxu0 %v4703_v63 }
 0x1bf   :  { %v1491_v0 = vadd.f32 %v1490_v52, %v1322_v17  ;;  %1384 = vmatmul.f32.gmra.mxu1 %v4698_v5 }
 0x1c0   :  { %1902 = vmatmul.f32.gmra.mxu3 %v3971_v53  ;;  %v4016_v53 = vand.u32 4294901760, %v121_v56 }
 0x1c1   :  { %v4005_v9 = vadd.f32 %v1835_v24, %v1491_v0  ;;  %1625 = vmatmul.f32.gmra.mxu2 %v1624_v50  ;;  %v1632_v24 = vand.u32 4294901760, %v1631_v15  ;;  %v4569_v0 = vand.u32 4294901760, %v4012_v19 }
 0x1c2   :  { %4707 = vst [vmem:[#allocation28_spill] sm:$0xff] %v4016_v53  ;;  %v4027_v15 = vsub.f32 %v121_v56, %v4016_v53 }
 0x1c3   :  { %4704 = vst [vmem:[#allocation22_spill] sm:$0xff] %v4005_v9  ;;  %v1168_v52 = vpop.f32.mrf.mxu0  ;;  %v4708_v9 = vld [vmem:[#allocation23_spill] sm:$0xff]  ;;  %v1639_v6 = vsub.f32 %v4012_v19, %v4569_v0 }
 0x1c4   :  { %v1325_v17 = vpop.f32.mrf.mxu1  ;;  %v1498_v42 = vpop.f32.mrf.mxu2  ;;  %4710 = vst [vmem:[#allocation57_spill] sm:$0xff] %v4027_v15 }
 0x1c5   :  { %v1326_v12 = vadd.f32 %v1325_v17, %v1165_v20  ;;  %v1839_v5 = vpop.f32.mrf.mxu3  ;;  %v1169_v20 = vadd.f32 %v1168_v52, %v4711_v59  ;;  %v123_v17 = vld [vmem:[#allocation3 + $0x168] sm:$0xff]  ;;  %v4716_v59 = vld [vmem:[#allocation32_spill] sm:$0xff] }
 0x1c6   :  { %1231 = vmatmul.f32.gmra.mxu0 %v4708_v9 }
 0x1c7   :  { %v1499_v50 = vadd.f32 %v1498_v42, %v1326_v12  ;;  %1388 = vmatmul.f32.gmra.mxu1 %v4703_v63 }
 0x1c8   :  { %1906 = vmatmul.f32.gmra.mxu3 %v3986_v23  ;;  %v4031_v23 = vand.u32 4294901760, %v123_v17 }
 0x1c9   :  { %v4020_v30 = vadd.f32 %v1839_v5, %v1499_v50  ;;  %1633 = vmatmul.f32.gmra.mxu2 %v1632_v24  ;;  %v1640_v5 = vand.u32 4294901760, %v1639_v6  ;;  %v4574_v50 = vand.u32 4294901760, %v4027_v15 }
 0x1ca   :  { %4712 = vst [vmem:[#allocation30_spill] sm:$0xff] %v4031_v23  ;;  %v4042_v6 = vsub.f32 %v123_v17, %v4031_v23 }
 0x1cb   :  { %4709 = vst [vmem:[#allocation23_spill] sm:$0xff] %v4020_v30  ;;  %v1172_v42 = vpop.f32.mrf.mxu0  ;;  %v4713_v30 = vld [vmem:[#allocation25_spill] sm:$0xff]  ;;  %v1647_v52 = vsub.f32 %v4027_v15, %v4574_v50 }
 0x1cc   :  { %v1329_v12 = vpop.f32.mrf.mxu1  ;;  %v1506_v16 = vpop.f32.mrf.mxu2  ;;  %4715 = vst [vmem:[#allocation58_spill] sm:$0xff] %v4042_v6 }
 0x1cd   :  { %v1330_v41 = vadd.f32 %v1329_v12, %v1169_v20  ;;  %v1843_v63 = vpop.f32.mrf.mxu3  ;;  %v1173_v20 = vadd.f32 %v1172_v42, %v4716_v59  ;;  %v125_v12 = vld [vmem:[#allocation3 + $0x178] sm:$0xff]  ;;  %v4721_v59 = vld [vmem:[#allocation34_spill] sm:$0xff] }
 0x1ce   :  { %1235 = vmatmul.f32.gmra.mxu0 %v4713_v30 }
 0x1cf   :  { %v1507_v24 = vadd.f32 %v1506_v16, %v1330_v41  ;;  %1392 = vmatmul.f32.gmra.mxu1 %v4708_v9 }
 0x1d0   :  { %1910 = vmatmul.f32.gmra.mxu3 %v4001_v3  ;;  %v4046_v3 = vand.u32 4294901760, %v125_v12 }
 0x1d1   :  { %v4035_v56 = vadd.f32 %v1843_v63, %v1507_v24  ;;  %1641 = vmatmul.f32.gmra.mxu2 %v1640_v5  ;;  %v1648_v63 = vand.u32 4294901760, %v1647_v52  ;;  %v4579_v24 = vand.u32 4294901760, %v4042_v6 }
 0x1d2   :  { %4717 = vst [vmem:[#allocation32_spill] sm:$0xff] %v4046_v3  ;;  %v4057_v52 = vsub.f32 %v125_v12, %v4046_v3 }
 0x1d3   :  { %4714 = vst [vmem:[#allocation25_spill] sm:$0xff] %v4035_v56  ;;  %v1176_v16 = vpop.f32.mrf.mxu0  ;;  %v4718_v56 = vld [vmem:[#allocation27_spill] sm:$0xff]  ;;  %v1655_v42 = vsub.f32 %v4042_v6, %v4579_v24 }
 0x1d4   :  { %v1333_v41 = vpop.f32.mrf.mxu1  ;;  %v1514_v19 = vpop.f32.mrf.mxu2  ;;  %4720 = vst [vmem:[#allocation59_spill] sm:$0xff] %v4057_v52 }
 0x1d5   :  { %v1334_v0 = vadd.f32 %v1333_v41, %v1173_v20  ;;  %v1847_v9 = vpop.f32.mrf.mxu3  ;;  %v1177_v20 = vadd.f32 %v1176_v16, %v4721_v59  ;;  %v127_v41 = vld [vmem:[#allocation3 + $0x188] sm:$0xff]  ;;  %v4726_v59 = vld [vmem:[#allocation35_spill] sm:$0xff] }
 0x1d6   :  { %1239 = vmatmul.f32.gmra.mxu0 %v4718_v56 }
 0x1d7   :  { %v1515_v5 = vadd.f32 %v1514_v19, %v1334_v0  ;;  %1396 = vmatmul.f32.gmra.mxu1 %v4713_v30 }
 0x1d8   :  { %1914 = vmatmul.f32.gmra.mxu3 %v4016_v53  ;;  %v4061_v53 = vand.u32 4294901760, %v127_v41 }
 0x1d9   :  { %v4050_v17 = vadd.f32 %v1847_v9, %v1515_v5  ;;  %1649 = vmatmul.f32.gmra.mxu2 %v1648_v63  ;;  %v1656_v9 = vand.u32 4294901760, %v1655_v42  ;;  %v4584_v5 = vand.u32 4294901760, %v4057_v52 }
 0x1da   :  { %4722 = vst [vmem:[#allocation34_spill] sm:$0xff] %v4061_v53  ;;  %v4072_v42 = vsub.f32 %v127_v41, %v4061_v53 }
 0x1db   :  { %4719 = vst [vmem:[#allocation27_spill] sm:$0xff] %v4050_v17  ;;  %v1180_v19 = vpop.f32.mrf.mxu0  ;;  %v4723_v17 = vld [vmem:[#allocation29_spill] sm:$0xff]  ;;  %v1663_v16 = vsub.f32 %v4057_v52, %v4584_v5 }
 0x1dc   :  { %v1337_v0 = vpop.f32.mrf.mxu1  ;;  %v1522_v15 = vpop.f32.mrf.mxu2  ;;  %4725 = vst [vmem:[#allocation60_spill] sm:$0xff] %v4072_v42 }
 0x1dd   :  { %v1338_v50 = vadd.f32 %v1337_v0, %v1177_v20  ;;  %v1851_v30 = vpop.f32.mrf.mxu3  ;;  %v1181_v20 = vadd.f32 %v1180_v19, %v4726_v59  ;;  %v129_v0 = vld [vmem:[#allocation3 + $0x198] sm:$0xff]  ;;  %v4731_v59 = vld [vmem:[#allocation37_spill] sm:$0xff] }
 0x1de   :  { %1243 = vmatmul.f32.gmra.mxu0 %v4723_v17 }
 0x1df   :  { %v1523_v63 = vadd.f32 %v1522_v15, %v1338_v50  ;;  %1400 = vmatmul.f32.gmra.mxu1 %v4718_v56 }
 0x1e0   :  { %1918 = vmatmul.f32.gmra.mxu3 %v4031_v23  ;;  %v4076_v23 = vand.u32 4294901760, %v129_v0 }
 0x1e1   :  { %v4065_v12 = vadd.f32 %v1851_v30, %v1523_v63  ;;  %1657 = vmatmul.f32.gmra.mxu2 %v1656_v9  ;;  %v1664_v30 = vand.u32 4294901760, %v1663_v16  ;;  %v4589_v63 = vand.u32 4294901760, %v4072_v42 }
 0x1e2   :  { %4727 = vst [vmem:[#allocation35_spill] sm:$0xff] %v4076_v23  ;;  %v4087_v16 = vsub.f32 %v129_v0, %v4076_v23 }
 0x1e3   :  { %4724 = vst [vmem:[#allocation29_spill] sm:$0xff] %v4065_v12  ;;  %v1184_v15 = vpop.f32.mrf.mxu0  ;;  %v4728_v12 = vld [vmem:[#allocation31_spill] sm:$0xff]  ;;  %v1671_v19 = vsub.f32 %v4072_v42, %v4589_v63 }
 0x1e4   :  { %v1341_v50 = vpop.f32.mrf.mxu1  ;;  %v1530_v6 = vpop.f32.mrf.mxu2  ;;  %4730 = vst [vmem:[#allocation61_spill] sm:$0xff] %v4087_v16 }
 0x1e5   :  { %v1342_v24 = vadd.f32 %v1341_v50, %v1181_v20  ;;  %v1855_v56 = vpop.f32.mrf.mxu3  ;;  %v1185_v20 = vadd.f32 %v1184_v15, %v4731_v59  ;;  %v131_v50 = vld [vmem:[#allocation3 + $0x1a8] sm:$0xff]  ;;  %v4734_v59 = vld [vmem:[#allocation38_spill] sm:$0xff] }
 0x1e6   :  { %1247 = vmatmul.f32.gmra.mxu0 %v4728_v12 }
 0x1e7   :  { %v1531_v9 = vadd.f32 %v1530_v6, %v1342_v24  ;;  %1404 = vmatmul.f32.gmra.mxu1 %v4723_v17 }
 0x1e8   :  { %1922 = vmatmul.f32.gmra.mxu3 %v4046_v3  ;;  %v4091_v3 = vand.u32 4294901760, %v131_v50 }
 0x1e9   :  { %v4080_v41 = vadd.f32 %v1855_v56, %v1531_v9  ;;  %1665 = vmatmul.f32.gmra.mxu2 %v1664_v30  ;;  %v1672_v56 = vand.u32 4294901760, %v1671_v19  ;;  %v4594_v9 = vand.u32 4294901760, %v4087_v16 }
 0x1ea   :  { %4732 = vst [vmem:[#allocation37_spill] sm:$0xff] %v4091_v3  ;;  %v4102_v19 = vsub.f32 %v131_v50, %v4091_v3 }
 0x1eb   :  { %4729 = vst [vmem:[#allocation31_spill] sm:$0xff] %v4080_v41  ;;  %v1188_v6 = vpop.f32.mrf.mxu0  ;;  %v4733_v41 = vld [vmem:[#allocation33_spill] sm:$0xff]  ;;  %v1679_v15 = vsub.f32 %v4087_v16, %v4594_v9 }
 0x1ec   :  { %v1345_v24 = vpop.f32.mrf.mxu1  ;;  %v1538_v52 = vpop.f32.mrf.mxu2 }
 0x1ed   :  { %v1346_v5 = vadd.f32 %v1345_v24, %v1185_v20  ;;  %v1859_v17 = vpop.f32.mrf.mxu3  ;;  %v1189_v20 = vadd.f32 %v1188_v6, %v4734_v59  ;;  %v133_v24 = vld [vmem:[#allocation3 + $0x1b8] sm:$0xff] }
 0x1ee   :  { %1251 = vmatmul.f32.gmra.mxu0 %v4733_v41  ;;  %v4737_v59 = vld [vmem:[#allocation39_spill] sm:$0xff] }
 0x1ef   :  { %v1539_v30 = vadd.f32 %v1538_v52, %v1346_v5  ;;  %1408 = vmatmul.f32.gmra.mxu1 %v4728_v12 }
 0x1f0   :  { %1926 = vmatmul.f32.gmra.mxu3 %v4061_v53  ;;  %v4106_v53 = vand.u32 4294901760, %v133_v24 }
 0x1f1   :  { %v4095_v0 = vadd.f32 %v1859_v17, %v1539_v30  ;;  %1673 = vmatmul.f32.gmra.mxu2 %v1672_v56  ;;  %v1680_v17 = vand.u32 4294901760, %v1679_v15  ;;  %v4599_v30 = vand.u32 4294901760, %v4102_v19 }
 0x1f2   :  { %4735 = vst [vmem:[#allocation33_spill] sm:$0xff] %v4106_v53  ;;  %v4117_v15 = vsub.f32 %v133_v24, %v4106_v53 }
 0x1f3   :  { %v1192_v52 = vpop.f32.mrf.mxu0  ;;  %v1687_v6 = vsub.f32 %v4102_v19, %v4599_v30 }
 0x1f4   :  { %v1349_v5 = vpop.f32.mrf.mxu1  ;;  %v1546_v42 = vpop.f32.mrf.mxu2 }
 0x1f5   :  { %v1350_v63 = vadd.f32 %v1349_v5, %v1189_v20  ;;  %v1863_v12 = vpop.f32.mrf.mxu3  ;;  %v1193_v20 = vadd.f32 %v1192_v52, %v4737_v59  ;;  %v135_v5 = vld [vmem:[#allocation3 + $0x1c8] sm:$0xff] }
 0x1f6   :  { %1255 = vmatmul.f32.gmra.mxu0 %v3600_v26 }
 0x1f7   :  { %v1547_v56 = vadd.f32 %v1546_v42, %v1350_v63  ;;  %1412 = vmatmul.f32.gmra.mxu1 %v4733_v41 }
 0x1f8   :  { %1930 = vmatmul.f32.gmra.mxu3 %v4076_v23  ;;  %v4121_v23 = vand.u32 4294901760, %v135_v5 }
 0x1f9   :  { %v4110_v50 = vadd.f32 %v1863_v12, %v1547_v56  ;;  %1681 = vmatmul.f32.gmra.mxu2 %v1680_v17  ;;  %v1688_v12 = vand.u32 4294901760, %v1687_v6  ;;  %v4602_v56 = vand.u32 4294901760, %v4117_v15 }
 0x1fa   :  { %4738 = vst [vmem:[#allocation39_spill] sm:$0xff] %v4121_v23  ;;  %v4132_v6 = vsub.f32 %v135_v5, %v4121_v23 }
 0x1fb   :  { %4736 = vst [vmem:[#allocation38_spill] sm:$0xff] %v4110_v50  ;;  %v1196_v42 = vpop.f32.mrf.mxu0  ;;  %v4739_v50 = vld [vmem:[#allocation36_spill] sm:$0xff]  ;;  %v1695_v52 = vsub.f32 %v4117_v15, %v4602_v56 }
 0x1fc   :  { %v1353_v63 = vpop.f32.mrf.mxu1  ;;  %v1554_v16 = vpop.f32.mrf.mxu2  ;;  %v1197_v59 = vadd.f32 %v1196_v42, %v3665_v28 }
 0x1fd   :  { %v1354_v9 = vadd.f32 %v1353_v63, %v1193_v20  ;;  %v1867_v41 = vpop.f32.mrf.mxu3  ;;  %v137_v20 = vld [vmem:[#allocation3 + $0x1d8] sm:$0xff] }
 0x1fe   :  { %1259 = vmatmul.f32.gmra.mxu0 %v4739_v50 }
 0x1ff   :  { %v1555_v17 = vadd.f32 %v1554_v16, %v1354_v9  ;;  %1416 = vmatmul.f32.gmra.mxu1 %v3600_v26 }
 0x200   :  { %1934 = vmatmul.f32.gmra.mxu3 %v4091_v3  ;;  %v4136_v3 = vand.u32 4294901760, %v137_v20 }
 0x201   :  { %v4125_v24 = vadd.f32 %v1867_v41, %v1555_v17  ;;  %1689 = vmatmul.f32.gmra.mxu2 %v1688_v12  ;;  %v1696_v41 = vand.u32 4294901760, %v1695_v52  ;;  %v4605_v17 = vand.u32 4294901760, %v4132_v6 }
 0x202   :  { %v4147_v42 = vsub.f32 %v137_v20, %v4136_v3 }
 0x203   :  { %v1200_v16 = vpop.f32.mrf.mxu0  ;;  %v1703_v28 = vsub.f32 %v4132_v6, %v4605_v17 }
 0x204   :  { %v1357_v9 = vpop.f32.mrf.mxu1  ;;  %v1562_v30 = vpop.f32.mrf.mxu2  ;;  %v1201_v52 = vadd.f32 %v1200_v16, %v3682_v57 }
 0x205   :  { %v1358_v63 = vadd.f32 %v1357_v9, %v1197_v59  ;;  %v1871_v26 = vpop.f32.mrf.mxu3  ;;  %v139_v59 = vld [vmem:[#allocation3 + $0x1e8] sm:$0xff] }
 0x206   :  { %1263 = vmatmul.f32.gmra.mxu0 %v3624_v45 }
 0x207   :  { %v1563_v12 = vadd.f32 %v1562_v30, %v1358_v63  ;;  %1420 = vmatmul.f32.gmra.mxu1 %v4739_v50 }
 0x208   :  { %1938 = vmatmul.f32.gmra.mxu3 %v4106_v53  ;;  %v4151_v53 = vand.u32 4294901760, %v139_v59 }
 0x209   :  { %v4140_v5 = vadd.f32 %v1871_v26, %v1563_v12  ;;  %1697 = vmatmul.f32.gmra.mxu2 %v1696_v41  ;;  %v1704_v26 = vand.u32 4294901760, %v1703_v28  ;;  %v4608_v12 = vand.u32 4294901760, %v4147_v42 }
 0x20a   :  { %v4162_v16 = vsub.f32 %v139_v59, %v4151_v53 }
 0x20b   :  { %v1204_v30 = vpop.f32.mrf.mxu0  ;;  %v1711_v57 = vsub.f32 %v4147_v42, %v4608_v12 }
 0x20c   :  { %v1361_v9 = vpop.f32.mrf.mxu1  ;;  %v1570_v56 = vpop.f32.mrf.mxu2  ;;  %v1205_v28 = vadd.f32 %v1204_v30, %v3698_v27 }
 0x20d   :  { %v1362_v63 = vadd.f32 %v1361_v9, %v1201_v52  ;;  %v1875_v50 = vpop.f32.mrf.mxu3  ;;  %v141_v52 = vld [vmem:[#allocation3 + $0x1f8] sm:$0xff] }
 0x20e   :  { %1267 = vmatmul.f32.gmra.mxu0 %v3642_v14 }
 0x20f   :  { %v1571_v41 = vadd.f32 %v1570_v56, %v1362_v63  ;;  %1424 = vmatmul.f32.gmra.mxu1 %v3624_v45 }
 0x210   :  { %1942 = vmatmul.f32.gmra.mxu3 %v4121_v23  ;;  %v4166_v23 = vand.u32 4294901760, %v141_v52 }
 0x211   :  { %v4155_v20 = vadd.f32 %v1875_v50, %v1571_v41  ;;  %1705 = vmatmul.f32.gmra.mxu2 %v1704_v26  ;;  %v1712_v50 = vand.u32 4294901760, %v1711_v57  ;;  %v4609_v41 = vand.u32 4294901760, %v4162_v16 }
 0x212   :  { %v4177_v30 = vsub.f32 %v141_v52, %v4166_v23 }
 0x213   :  { %v1208_v56 = vpop.f32.mrf.mxu0  ;;  %v1719_v27 = vsub.f32 %v4162_v16, %v4609_v41 }
 0x214   :  { %v1365_v9 = vpop.f32.mrf.mxu1  ;;  %v1578_v17 = vpop.f32.mrf.mxu2  ;;  %v1209_v57 = vadd.f32 %v1208_v56, %v3713_v7 }
 0x215   :  { %v1366_v63 = vadd.f32 %v1365_v9, %v1205_v28  ;;  %v1879_v45 = vpop.f32.mrf.mxu3 }
 0x216   :  { %1271 = vmatmul.f32.gmra.mxu0 %v3648_v44 }
 0x217   :  { %v1579_v26 = vadd.f32 %v1578_v17, %v1366_v63  ;;  %1428 = vmatmul.f32.gmra.mxu1 %v3642_v14  ;;  %v1720_v14 = vand.u32 4294901760, %v1719_v27 }
 0x218   :  { %1946 = vmatmul.f32.gmra.mxu3 %v4136_v3 }
 0x219   :  { %v4170_v59 = vadd.f32 %v1879_v45, %v1579_v26  ;;  %1713 = vmatmul.f32.gmra.mxu2 %v1712_v50  ;;  %v1726_v45 = vand.u32 4294901760, %v4177_v30 }
 0x21b   :  { %v1212_v28 = vpop.f32.mrf.mxu0  ;;  %v1727_v7 = vsub.f32 %v4177_v30, %v1726_v45 }
 0x21c   :  { %v1369_v17 = vpop.f32.mrf.mxu1  ;;  %v1586_v63 = vpop.f32.mrf.mxu2  ;;  %v1213_v52 = vadd.f32 %v1212_v28, %v3732_v25 }
 0x21d   :  { %v1370_v9 = vadd.f32 %v1369_v17, %v1209_v57  ;;  %v1883_v12 = vpop.f32.mrf.mxu3 }
 0x21e   :  { %1275 = vmatmul.f32.gmra.mxu0 %v3670_v60 }
 0x21f   :  { %v1587_v26 = vadd.f32 %v1586_v63, %v1370_v9  ;;  %1432 = vmatmul.f32.gmra.mxu1 %v3648_v44  ;;  %v1728_v63 = vand.u32 4294901760, %v1727_v7 }
 0x220   :  { %1950 = vmatmul.f32.gmra.mxu3 %v4151_v53 }
 0x221   :  { %v4183_v50 = vadd.f32 %v1883_v12, %v1587_v26  ;;  %1721 = vmatmul.f32.gmra.mxu2 %v1720_v14 }
 0x223   :  { %v1216_v56 = vpop.f32.mrf.mxu0 }
 0x224   :  { %v1373_v27 = vpop.f32.mrf.mxu1  ;;  %v1594_v17 = vpop.f32.mrf.mxu2  ;;  %v1217_v12 = vadd.f32 %v1216_v56, %v3751_v1 }
 0x225   :  { %v1374_v57 = vadd.f32 %v1373_v27, %v1213_v52  ;;  %v1887_v9 = vpop.f32.mrf.mxu3 }
 0x226   :  { %1279 = vmatmul.f32.gmra.mxu0 %v3685_v34 }
 0x227   :  { %v1595_v41 = vadd.f32 %v1594_v17, %v1374_v57  ;;  %1436 = vmatmul.f32.gmra.mxu1 %v3670_v60 }
 0x228   :  { %1954 = vmatmul.f32.gmra.mxu3 %v4166_v23 }
 0x229   :  { %v4192_v44 = vadd.f32 %v1887_v9, %v1595_v41  ;;  %1729 = vmatmul.f32.gmra.mxu2 %v1728_v63 }
 0x22b   :  { %v1220_v14 = vpop.f32.mrf.mxu0 }
 0x22c   :  { %v1377_v25 = vpop.f32.mrf.mxu1  ;;  %v1602_v26 = vpop.f32.mrf.mxu2  ;;  %v1221_v60 = vadd.f32 %v1220_v14, %v3765_v4 }
 0x22d   :  { %v1378_v28 = vadd.f32 %v1377_v25, %v1217_v12  ;;  %v1891_v52 = vpop.f32.mrf.mxu3 }
 0x22e   :  { %2008 = vmatmul.f32.vlgmr.msra.gmra.mxu0 %v3716_v36 }
 0x22f   :  { %v1603_v27 = vadd.f32 %v1602_v26, %v1378_v28  ;;  %1440 = vmatmul.f32.gmra.mxu1 %v3685_v34  ;;  %v4740_v34 = vand.u32 4294901760, %v3716_v36 }
 0x230   :  { %2618 = vmatmul.f32.vlgmr.msra.gmra.mxu3 %v3706_v18 }
 0x231   :  { %v4198_v7 = vadd.f32 %v1891_v52, %v1603_v27  ;;  %2457 = vmatmul.f32.vlgmr.msra.gmra.mxu2 %v3706_v18  ;;  %v4741_v52 = vand.u32 4294901760, %v3738_v58 }
 0x233   :  { %v1224_v41 = vpop.f32.mrf.mxu0 }
 0x234   :  { %v1381_v1 = vpop.f32.mrf.mxu1  ;;  %v1610_v57 = vpop.f32.mrf.mxu2  ;;  %v1225_v18 = vadd.f32 %v1224_v41, %v3779_v10 }
 0x235   :  { %v1382_v56 = vadd.f32 %v1381_v1, %v1221_v60  ;;  %v1895_v17 = vpop.f32.mrf.mxu3 }
 0x236   :  { %2013 = vmatmul.f32.gmra.mxu0 %v3738_v58 }
 0x237   :  { %v1611_v9 = vadd.f32 %v1610_v57, %v1382_v56  ;;  %2202 = vmatmul.f32.vlgmr.msra.gmra.mxu1 %v4740_v34  ;;  %v4742_v57 = vand.u32 4294901760, %v3758_v33 }
 0x238   :  { %2622 = vmatmul.f32.gmra.mxu3 %v3725_v38 }
 0x239   :  { %v4206_v63 = vadd.f32 %v1895_v17, %v1611_v9  ;;  %2461 = vmatmul.f32.gmra.mxu2 %v3725_v38 }
 0x23b   :  { %v1228_v4 = vpop.f32.mrf.mxu0 }
 0x23c   :  { %v1385_v12 = vpop.f32.mrf.mxu1  ;;  %v1618_v25 = vpop.f32.mrf.mxu2  ;;  %v1229_v38 = vadd.f32 %v1228_v4, %v3793_v29 }
 0x23d   :  { %v1386_v14 = vadd.f32 %v1385_v12, %v1225_v18  ;;  %v1899_v28 = vpop.f32.mrf.mxu3  ;;  %v4743_v12 = vand.u32 4294901760, %v3772_v35 }
 0x23e   :  { %2018 = vmatmul.f32.gmra.mxu0 %v3758_v33 }
 0x23f   :  { %v1619_v26 = vadd.f32 %v1618_v25, %v1386_v14  ;;  %2208 = vmatmul.f32.gmra.mxu1 %v4741_v52 }
 0x240   :  { %2626 = vmatmul.f32.gmra.mxu3 %v3747_v11 }
 0x241   :  { %v4214_v36 = vadd.f32 %v1899_v28, %v1619_v26  ;;  %2465 = vmatmul.f32.gmra.mxu2 %v3747_v11 }
 0x243   :  { %v1232_v10 = vpop.f32.mrf.mxu0 }
 0x244   :  { %v1389_v27 = vpop.f32.mrf.mxu1  ;;  %v1626_v41 = vpop.f32.mrf.mxu2  ;;  %v1233_v11 = vadd.f32 %v1232_v10, %v3807_v13 }
 0x245   :  { %v1390_v60 = vadd.f32 %v1389_v27, %v1229_v38  ;;  %v1903_v1 = vpop.f32.mrf.mxu3  ;;  %v4744_v38 = vand.u32 4294901760, %v3786_v55 }
 0x246   :  { %2023 = vmatmul.f32.gmra.mxu0 %v3772_v35 }
 0x247   :  { %v1627_v56 = vadd.f32 %v1626_v41, %v1390_v60  ;;  %2214 = vmatmul.f32.gmra.mxu1 %v4742_v57 }
 0x248   :  { %2630 = vmatmul.f32.gmra.mxu3 %v3761_v8 }
 0x249   :  { %v4222_v58 = vadd.f32 %v1903_v1, %v1627_v56  ;;  %2469 = vmatmul.f32.gmra.mxu2 %v3761_v8  ;;  %v4745_v56 = vand.u32 4294901760, %v3800_v40 }
 0x24b   :  { %v1236_v29 = vpop.f32.mrf.mxu0 }
 0x24c   :  { %v1393_v17 = vpop.f32.mrf.mxu1  ;;  %v1634_v34 = vpop.f32.mrf.mxu2  ;;  %v1237_v8 = vadd.f32 %v1236_v29, %v3821_v54 }
 0x24d   :  { %v1394_v9 = vadd.f32 %v1393_v17, %v1233_v11  ;;  %v1907_v18 = vpop.f32.mrf.mxu3 }
 0x24e   :  { %2028 = vmatmul.f32.gmra.mxu0 %v3786_v55 }
 0x24f   :  { %v1635_v4 = vadd.f32 %v1634_v34, %v1394_v9  ;;  %2220 = vmatmul.f32.gmra.mxu1 %v4743_v12  ;;  %v4746_v34 = vand.u32 4294901760, %v3814_v2 }
 0x250   :  { %2634 = vmatmul.f32.gmra.mxu3 %v3775_v49 }
 0x251   :  { %v4230_v33 = vadd.f32 %v1907_v18, %v1635_v4  ;;  %2473 = vmatmul.f32.gmra.mxu2 %v3775_v49 }
 0x253   :  { %v1240_v13 = vpop.f32.mrf.mxu0 }
 0x254   :  { %v1397_v14 = vpop.f32.mrf.mxu1  ;;  %v1642_v28 = vpop.f32.mrf.mxu2  ;;  %v1241_v49 = vadd.f32 %v1240_v13, %v3835_v39 }
 0x255   :  { %v1398_v25 = vadd.f32 %v1397_v14, %v1237_v8  ;;  %v1911_v26 = vpop.f32.mrf.mxu3  ;;  %v4747_v14 = vand.u32 4294901760, %v3828_v22 }
 0x256   :  { %2033 = vmatmul.f32.gmra.mxu0 %v3800_v40 }
 0x257   :  { %v1643_v52 = vadd.f32 %v1642_v28, %v1398_v25  ;;  %2226 = vmatmul.f32.gmra.mxu1 %v4744_v38 }
 0x258   :  { %2638 = vmatmul.f32.gmra.mxu3 %v3789_v62 }
 0x259   :  { %v4238_v35 = vadd.f32 %v1911_v26, %v1643_v52  ;;  %2477 = vmatmul.f32.gmra.mxu2 %v3789_v62 }
 0x25b   :  { %v1244_v54 = vpop.f32.mrf.mxu0 }
 0x25c   :  { %v1401_v10 = vpop.f32.mrf.mxu1  ;;  %v1650_v60 = vpop.f32.mrf.mxu2  ;;  %v1245_v62 = vadd.f32 %v1244_v54, %v3849_v46 }
 0x25d   :  { %v1402_v27 = vadd.f32 %v1401_v10, %v1241_v49  ;;  %v1915_v41 = vpop.f32.mrf.mxu3  ;;  %v4748_v49 = vand.u32 4294901760, %v3842_v31 }
 0x25e   :  { %2038 = vmatmul.f32.gmra.mxu0 %v3814_v2 }
 0x25f   :  { %v1651_v1 = vadd.f32 %v1650_v60, %v1402_v27  ;;  %2232 = vmatmul.f32.gmra.mxu1 %v4745_v56  ;;  %v4750_v56 = vand.u32 4294901760, %v3856_v21 }
 0x260   :  { %2642 = vmatmul.f32.gmra.mxu3 %v3803_v48 }
 0x261   :  { %v4246_v55 = vadd.f32 %v1915_v41, %v1651_v1  ;;  %2481 = vmatmul.f32.gmra.mxu2 %v3803_v48  ;;  %v4749_v1 = vld [vmem:[#allocation12_spill] sm:$0xff] }
 0x263   :  { %v1248_v39 = vpop.f32.mrf.mxu0 }
 0x264   :  { %v1405_v57 = vpop.f32.mrf.mxu1  ;;  %v1658_v29 = vpop.f32.mrf.mxu2  ;;  %v1249_v48 = vadd.f32 %v1248_v39, %v3863_v37 }
 0x265   :  { %v1406_v11 = vadd.f32 %v1405_v57, %v1245_v62  ;;  %v1919_v17 = vpop.f32.mrf.mxu3  ;;  %v4751_v62 = vld [vmem:[#allocation40_spill] sm:$0xff] }
 0x266   :  { %2043 = vmatmul.f32.gmra.mxu0 %v3828_v22 }
 0x267   :  { %v1659_v9 = vadd.f32 %v1658_v29, %v1406_v11  ;;  %2238 = vmatmul.f32.gmra.mxu1 %v4746_v34  ;;  %v4753_v34 = vld [vmem:[#allocation13_spill] sm:$0xff] }
 0x268   :  { %2646 = vmatmul.f32.gmra.mxu3 %v3817_v51 }
 0x269   :  { %v4254_v40 = vadd.f32 %v1919_v17, %v1659_v9  ;;  %2485 = vmatmul.f32.gmra.mxu2 %v3817_v51 }
 0x26b   :  { %v1252_v46 = vpop.f32.mrf.mxu0 }
 0x26c   :  { %v1409_v18 = vpop.f32.mrf.mxu1  ;;  %v1666_v12 = vpop.f32.mrf.mxu2  ;;  %v1253_v51 = vadd.f32 %v1252_v46, %v3877_v47  ;;  %v4755_v46 = vld [vmem:[#allocation41_spill] sm:$0xff] }
 0x26d   :  { %v1410_v4 = vadd.f32 %v1409_v18, %v1249_v48  ;;  %v1923_v8 = vpop.f32.mrf.mxu3  ;;  %v4754_v48 = vand.u32 4294901760, %v4749_v1  ;;  %v4756_v18 = vld [vmem:[#allocation16_spill] sm:$0xff] }
 0x26e   :  { %2048 = vmatmul.f32.gmra.mxu0 %v3842_v31 }
 0x26f   :  { %v1667_v13 = vadd.f32 %v1666_v12, %v1410_v4  ;;  %2244 = vmatmul.f32.gmra.mxu1 %v4747_v14 }
 0x270   :  { %2650 = vmatmul.f32.gmra.mxu3 %v3831_v43 }
 0x271   :  { %v4262_v2 = vadd.f32 %v1923_v8, %v1667_v13  ;;  %2489 = vmatmul.f32.gmra.mxu2 %v3831_v43 }
 0x273   :  { %v1256_v37 = vpop.f32.mrf.mxu0 }
 0x274   :  { %v1413_v25 = vpop.f32.mrf.mxu1  ;;  %v1674_v26 = vpop.f32.mrf.mxu2  ;;  %v1257_v43 = vadd.f32 %v1256_v37, %v3891_v32 }
 0x275   :  { %v1414_v28 = vadd.f32 %v1413_v25, %v1253_v51  ;;  %v1927_v52 = vpop.f32.mrf.mxu3  ;;  %v4757_v25 = vld [vmem:[#allocation14_spill] sm:$0xff] }
 0x276   :  { %2053 = vmatmul.f32.gmra.mxu0 %v3856_v21 }
 0x277   :  { %v1675_v38 = vadd.f32 %v1674_v26, %v1414_v28  ;;  %2250 = vmatmul.f32.gmra.mxu1 %v4748_v49  ;;  %v4758_v28 = vand.u32 4294901760, %v4753_v34 }
 0x278   :  { %2654 = vmatmul.f32.gmra.mxu3 %v3845_v61 }
 0x279   :  { %v4270_v22 = vadd.f32 %v1927_v52, %v1675_v38  ;;  %2493 = vmatmul.f32.gmra.mxu2 %v3845_v61  ;;  %v4752_v61 = vld [vmem:[#allocation15_spill] sm:$0xff]  ;;  %v4759_v52 = vld [vmem:[#allocation42_spill] sm:$0xff]  ;;  %v4760_v38 = vld [vmem:[#allocation17_spill] sm:$0xff] }
 0x27b   :  { %v1260_v47 = vpop.f32.mrf.mxu0 }
 0x27c   :  { %v1417_v54 = vpop.f32.mrf.mxu1  ;;  %v1682_v27 = vpop.f32.mrf.mxu2  ;;  %v1261_v39 = vadd.f32 %v1260_v47, %v4752_v61  ;;  %v4764_v61 = vld [vmem:[#allocation18_spill] sm:$0xff] }
 0x27d   :  { %v1418_v10 = vadd.f32 %v1417_v54, %v1257_v43  ;;  %v1931_v60 = vpop.f32.mrf.mxu3 }
 0x27e   :  { %2058 = vmatmul.f32.gmra.mxu0 %v4749_v1  ;;  %v4762_v1 = vand.u32 4294901760, %v4757_v25 }
 0x27f   :  { %v1683_v41 = vadd.f32 %v1682_v27, %v1418_v10  ;;  %2256 = vmatmul.f32.gmra.mxu1 %v4750_v56 }
 0x280   :  { %2658 = vmatmul.f32.gmra.mxu3 %v4751_v62 }
 0x281   :  { %v4278_v31 = vadd.f32 %v1931_v60, %v1683_v41  ;;  %2497 = vmatmul.f32.gmra.mxu2 %v4751_v62  ;;  %v4761_v41 = vld [vmem:[#allocation44_spill] sm:$0xff]  ;;  %v4763_v62 = vld [vmem:[#allocation43_spill] sm:$0xff] }
 0x283   :  { %v1264_v32 = vpop.f32.mrf.mxu0 }
 0x284   :  { %v1421_v57 = vpop.f32.mrf.mxu1  ;;  %v1690_v29 = vpop.f32.mrf.mxu2  ;;  %v1265_v4 = vadd.f32 %v1264_v32, %v4756_v18  ;;  %v4767_v18 = vld [vmem:[#allocation45_spill] sm:$0xff] }
 0x285   :  { %v1422_v11 = vadd.f32 %v1421_v57, %v1261_v39  ;;  %v1935_v17 = vpop.f32.mrf.mxu3 }
 0x286   :  { %2063 = vmatmul.f32.gmra.mxu0 %v4753_v34  ;;  %v4765_v34 = vld [vmem:[#allocation46_spill] sm:$0xff] }
 0x287   :  { %v1691_v9 = vadd.f32 %v1690_v29, %v1422_v11  ;;  %2262 = vmatmul.f32.gmra.mxu1 %v4754_v48  ;;  %v4766_v48 = vand.u32 4294901760, %v4761_v41 }
 0x288   :  { %2662 = vmatmul.f32.gmra.mxu3 %v4755_v46 }
 0x289   :  { %v4286_v21 = vadd.f32 %v1935_v17, %v1691_v9  ;;  %2501 = vmatmul.f32.gmra.mxu2 %v4755_v46 }
 0x28b   :  { %v1268_v12 = vpop.f32.mrf.mxu0 }
 0x28c   :  { %v1425_v8 = vpop.f32.mrf.mxu1  ;;  %v1698_v14 = vpop.f32.mrf.mxu2  ;;  %v1269_v49 = vadd.f32 %v1268_v12, %v4760_v38 }
 0x28d   :  { %v1426_v13 = vadd.f32 %v1425_v8, %v1265_v4  ;;  %v1939_v51 = vpop.f32.mrf.mxu3  ;;  %v4768_v4 = vld [vmem:[#allocation19_spill] sm:$0xff] }
 0x28e   :  { %2068 = vmatmul.f32.gmra.mxu0 %v4757_v25 }
 0x28f   :  { %v1699_v37 = vadd.f32 %v1698_v14, %v1426_v13  ;;  %2268 = vmatmul.f32.gmra.mxu1 %v4758_v28  ;;  %v4769_v28 = vld [vmem:[#allocation48_spill] sm:$0xff] }
 0x290   :  { %2666 = vmatmul.f32.gmra.mxu3 %v4759_v52 }
 0x291   :  { %v4294_v26 = vadd.f32 %v1939_v51, %v1699_v37  ;;  %2505 = vmatmul.f32.gmra.mxu2 %v4759_v52  ;;  %v4770_v52 = vand.u32 4294901760, %v4765_v34 }
 0x293   :  { %v1272_v43 = vpop.f32.mrf.mxu0 }
 0x294   :  { %v1429_v47 = vpop.f32.mrf.mxu1  ;;  %v1706_v10 = vpop.f32.mrf.mxu2  ;;  %v1273_v39 = vadd.f32 %v1272_v43, %v4764_v61  ;;  %v4772_v43 = vld [vmem:[#allocation20_spill] sm:$0xff]  ;;  %v4774_v61 = vand.u32 4294901760, %v4769_v28 }
 0x295   :  { %v1430_v54 = vadd.f32 %v1429_v47, %v1269_v49  ;;  %v1943_v27 = vpop.f32.mrf.mxu3  ;;  %v4771_v49 = vld [vmem:[#allocation47_spill] sm:$0xff] }
 0x296   :  { %2073 = vmatmul.f32.gmra.mxu0 %v4761_v41 }
 0x297   :  { %v1707_v60 = vadd.f32 %v1706_v10, %v1430_v54  ;;  %2274 = vmatmul.f32.gmra.mxu1 %v4762_v1 }
 0x298   :  { %2670 = vmatmul.f32.gmra.mxu3 %v4763_v62 }
 0x299   :  { %v4302_v56 = vadd.f32 %v1943_v27, %v1707_v60  ;;  %2509 = vmatmul.f32.gmra.mxu2 %v4763_v62  ;;  %v4773_v62 = vld [vmem:[#allocation50_spill] sm:$0xff] }
 0x29b   :  { %v1276_v32 = vpop.f32.mrf.mxu0 }
 0x29c   :  { %v1433_v57 = vpop.f32.mrf.mxu1  ;;  %v1714_v29 = vpop.f32.mrf.mxu2  ;;  %v1277_v12 = vadd.f32 %v1276_v32, %v4768_v4  ;;  %v4775_v32 = vld [vmem:[#allocation49_spill] sm:$0xff]  ;;  %v4777_v4 = vld [vmem:[#allocation52_spill] sm:$0xff] }
 0x29d   :  { %v1434_v11 = vadd.f32 %v1433_v57, %v1273_v39  ;;  %v1947_v17 = vpop.f32.mrf.mxu3  ;;  %v4776_v57 = vld [vmem:[#allocation21_spill] sm:$0xff] }
 0x29e   :  { %2078 = vmatmul.f32.gmra.mxu0 %v4765_v34 }
 0x29f   :  { %v1715_v9 = vadd.f32 %v1714_v29, %v1434_v11  ;;  %2280 = vmatmul.f32.gmra.mxu1 %v4766_v48 }
 0x2a0   :  { %2674 = vmatmul.f32.gmra.mxu3 %v4767_v18 }
 0x2a1   :  { %v4310_v46 = vadd.f32 %v1947_v17, %v1715_v9  ;;  %2513 = vmatmul.f32.gmra.mxu2 %v4767_v18 }
 0x2a3   :  { %v1280_v8 = vpop.f32.mrf.mxu0 }
 0x2a4   :  { %v1437_v13 = vpop.f32.mrf.mxu1  ;;  %v1722_v51 = vpop.f32.mrf.mxu2  ;;  %v1281_v47 = vadd.f32 %v1280_v8, %v4772_v43 }
 0x2a5   :  { %v1438_v14 = vadd.f32 %v1437_v13, %v1277_v12  ;;  %v1951_v37 = vpop.f32.mrf.mxu3  ;;  %v4778_v12 = vand.u32 4294901760, %v4773_v62  ;;  %v4779_v13 = vld [vmem:[#allocation51_spill] sm:$0xff] }
 0x2a6   :  { %2083 = vmatmul.f32.gmra.mxu0 %v4769_v28 }
 0x2a7   :  { %v1723_v25 = vadd.f32 %v1722_v51, %v1438_v14  ;;  %2286 = vmatmul.f32.gmra.mxu1 %v4770_v52  ;;  %v4780_v14 = vld [vmem:[#allocation22_spill] sm:$0xff] }
 0x2a8   :  { %2678 = vmatmul.f32.gmra.mxu3 %v4771_v49 }
 0x2a9   :  { %v4318_v38 = vadd.f32 %v1951_v37, %v1723_v25  ;;  %2517 = vmatmul.f32.gmra.mxu2 %v4771_v49 }
 0x2ab   :  { %v2009_v10 = vpop.f32.mrf.mxu0 }
 0x2ac   :  { %v1441_v54 = vpop.f32.mrf.mxu1  ;;  %v1730_v60 = vpop.f32.mrf.mxu2  ;;  %v2010_v11 = vadd.f32 %v2009_v10, %v4776_v57 }
 0x2ad   :  { %v1442_v27 = vadd.f32 %v1441_v54, %v1281_v47  ;;  %v1955_v41 = vpop.f32.mrf.mxu3  ;;  %v4781_v47 = vld [vmem:[#allocation54_spill] sm:$0xff]  ;;  %v4782_v54 = vand.u32 4294901760, %v4777_v4 }
 0x2ae   :  { %2088 = vmatmul.f32.gmra.mxu0 %v4773_v62 }
 0x2af   :  { %v1731_v1 = vadd.f32 %v1730_v60, %v1442_v27  ;;  %2292 = vmatmul.f32.gmra.mxu1 %v4774_v61  ;;  %v4783_v27 = vld [vmem:[#allocation53_spill] sm:$0xff]  ;;  %v4784_v60 = vld [vmem:[#allocation23_spill] sm:$0xff] }
 0x2b0   :  { %2682 = vmatmul.f32.gmra.mxu3 %v4775_v32 }
 0x2b1   :  { %v4326_v39 = vadd.f32 %v1955_v41, %v1731_v1  ;;  %2521 = vmatmul.f32.gmra.mxu2 %v4775_v32 }
 0x2b3   :  { %v2014_v29 = vpop.f32.mrf.mxu0 }
 0x2b4   :  { %v2203_v17 = vpop.f32.mrf.mxu1  ;;  %v2458_v34 = vpop.f32.mrf.mxu2  ;;  %v2015_v51 = vadd.f32 %v2014_v29, %v4780_v14  ;;  %v4785_v29 = vld [vmem:[#allocation55_spill] sm:$0xff] }
 0x2b5   :  { %v2204_v9 = vadd.f32 %v2203_v17, %v2010_v11  ;;  %v2619_v48 = vpop.f32.mrf.mxu3  ;;  %v4786_v17 = vand.u32 4294901760, %v4781_v47 }
 0x2b6   :  { %2093 = vmatmul.f32.gmra.mxu0 %v4777_v4 }
 0x2b7   :  { %v2459_v18 = vadd.f32 %v2458_v34, %v2204_v9  ;;  %2298 = vmatmul.f32.gmra.mxu1 %v4778_v12  ;;  %v4787_v34 = vld [vmem:[#allocation24_spill] sm:$0xff] }
 0x2b8   :  { %2686 = vmatmul.f32.gmra.mxu3 %v4779_v13 }
 0x2b9   :  { %v2620_v8 = vadd.f32 %v2619_v48, %v2459_v18  ;;  %2525 = vmatmul.f32.gmra.mxu2 %v4779_v13  ;;  %v4788_v48 = vld [vmem:[#allocation25_spill] sm:$0xff] }
 0x2bb   :  { %2917 = vst [vmem:[#allocation8] sm:$0xff] %v2620_v8  ;;  %v2019_v37 = vpop.f32.mrf.mxu0 }
 0x2bc   :  { %v2209_v25 = vpop.f32.mrf.mxu1  ;;  %v2462_v52 = vpop.f32.mrf.mxu2  ;;  %v2020_v41 = vadd.f32 %v2019_v37, %v4784_v60  ;;  %v4789_v37 = vld [vmem:[#allocation56_spill] sm:$0xff] }
 0x2bd   :  { %v2210_v28 = vadd.f32 %v2209_v25, %v2015_v51  ;;  %v2623_v49 = vpop.f32.mrf.mxu3  ;;  %v4790_v25 = vand.u32 4294901760, %v4785_v29 }
 0x2be   :  { %2098 = vmatmul.f32.gmra.mxu0 %v4781_v47 }
 0x2bf   :  { %v2463_v43 = vadd.f32 %v2462_v52, %v2210_v28  ;;  %2304 = vmatmul.f32.gmra.mxu1 %v4782_v54  ;;  %v4791_v52 = vld [vmem:[#allocation26_spill] sm:$0xff] }
 0x2c0   :  { %2690 = vmatmul.f32.gmra.mxu3 %v4783_v27 }
 0x2c1   :  { %v2624_v10 = vadd.f32 %v2623_v49, %v2463_v43  ;;  %2529 = vmatmul.f32.gmra.mxu2 %v4783_v27  ;;  %v4792_v49 = vld [vmem:[#allocation27_spill] sm:$0xff] }
 0x2c3   :  { %2918 = vst [vmem:[#allocation8 + $0x8] sm:$0xff] %v2624_v10  ;;  %v2024_v1 = vpop.f32.mrf.mxu0 }
 0x2c4   :  { %v2215_v62 = vpop.f32.mrf.mxu1  ;;  %v2466_v32 = vpop.f32.mrf.mxu2  ;;  %v2025_v18 = vadd.f32 %v2024_v1, %v4788_v48  ;;  %v4793_v1 = vld [vmem:[#allocation57_spill] sm:$0xff] }
 0x2c5   :  { %v2216_v61 = vadd.f32 %v2215_v62, %v2020_v41  ;;  %v2627_v57 = vpop.f32.mrf.mxu3  ;;  %v4794_v62 = vand.u32 4294901760, %v4789_v37 }
 0x2c6   :  { %2103 = vmatmul.f32.gmra.mxu0 %v4785_v29 }
 0x2c7   :  { %v2467_v11 = vadd.f32 %v2466_v32, %v2216_v61  ;;  %2310 = vmatmul.f32.gmra.mxu1 %v4786_v17  ;;  %v4795_v32 = vld [vmem:[#allocation28_spill] sm:$0xff] }
 0x2c8   :  { %2694 = vmatmul.f32.gmra.mxu3 %v4787_v34 }
 0x2c9   :  { %v2628_v9 = vadd.f32 %v2627_v57, %v2467_v11  ;;  %2533 = vmatmul.f32.gmra.mxu2 %v4787_v34  ;;  %v4796_v57 = vld [vmem:[#allocation29_spill] sm:$0xff] }
 0x2cb   :  { %2919 = vst [vmem:[#allocation8 + $0x10] sm:$0xff] %v2628_v9  ;;  %v2029_v4 = vpop.f32.mrf.mxu0 }
 0x2cc   :  { %v2221_v12 = vpop.f32.mrf.mxu1  ;;  %v2470_v13 = vpop.f32.mrf.mxu2  ;;  %v2030_v43 = vadd.f32 %v2029_v4, %v4792_v49  ;;  %v4797_v4 = vld [vmem:[#allocation58_spill] sm:$0xff] }
 0x2cd   :  { %v2222_v8 = vadd.f32 %v2221_v12, %v2025_v18  ;;  %v2631_v14 = vpop.f32.mrf.mxu3  ;;  %v4798_v12 = vand.u32 4294901760, %v4793_v1 }
 0x2ce   :  { %2108 = vmatmul.f32.gmra.mxu0 %v4789_v37 }
 0x2cf   :  { %v2471_v51 = vadd.f32 %v2470_v13, %v2222_v8  ;;  %2316 = vmatmul.f32.gmra.mxu1 %v4790_v25  ;;  %v4799_v13 = vld [vmem:[#allocation30_spill] sm:$0xff] }
 0x2d0   :  { %2698 = vmatmul.f32.gmra.mxu3 %v4791_v52 }
 0x2d1   :  { %v2632_v28 = vadd.f32 %v2631_v14, %v2471_v51  ;;  %2537 = vmatmul.f32.gmra.mxu2 %v4791_v52  ;;  %v4800_v14 = vld [vmem:[#allocation31_spill] sm:$0xff] }
 0x2d3   :  { %2920 = vst [vmem:[#allocation8 + $0x18] sm:$0xff] %v2632_v28  ;;  %v2034_v47 = vpop.f32.mrf.mxu0 }
 0x2d4   :  { %v2227_v54 = vpop.f32.mrf.mxu1  ;;  %v2474_v27 = vpop.f32.mrf.mxu2  ;;  %v2035_v11 = vadd.f32 %v2034_v47, %v4796_v57  ;;  %v4801_v47 = vld [vmem:[#allocation59_spill] sm:$0xff] }
 0x2d5   :  { %v2228_v10 = vadd.f32 %v2227_v54, %v2030_v43  ;;  %v2635_v60 = vpop.f32.mrf.mxu3  ;;  %v4802_v54 = vand.u32 4294901760, %v4797_v4 }
 0x2d6   :  { %2113 = vmatmul.f32.gmra.mxu0 %v4793_v1 }
 0x2d7   :  { %v2475_v41 = vadd.f32 %v2474_v27, %v2228_v10  ;;  %2322 = vmatmul.f32.gmra.mxu1 %v4794_v62  ;;  %v4803_v27 = vld [vmem:[#allocation32_spill] sm:$0xff] }
 0x2d8   :  { %2702 = vmatmul.f32.gmra.mxu3 %v4795_v32 }
 0x2d9   :  { %v2636_v61 = vadd.f32 %v2635_v60, %v2475_v41  ;;  %2541 = vmatmul.f32.gmra.mxu2 %v4795_v32 }
 0x2db   :  { %2921 = vst [vmem:[#allocation8 + $0x20] sm:$0xff] %v2636_v61  ;;  %v2039_v29 = vpop.f32.mrf.mxu0 }
 0x2dc   :  { %v2233_v17 = vpop.f32.mrf.mxu1  ;;  %v2478_v34 = vpop.f32.mrf.mxu2  ;;  %v2040_v51 = vadd.f32 %v2039_v29, %v4800_v14  ;;  %v4805_v29 = vand.u32 4294901760, %v4801_v47  ;;  %v4808_v14 = vld [vmem:[#allocation61_spill] sm:$0xff] }
 0x2dd   :  { %v2234_v9 = vadd.f32 %v2233_v17, %v2035_v11  ;;  %v2639_v48 = vpop.f32.mrf.mxu3  ;;  %v4804_v11 = vld [vmem:[#allocation60_spill] sm:$0xff] }
 0x2de   :  { %2118 = vmatmul.f32.gmra.mxu0 %v4797_v4 }
 0x2df   :  { %v2479_v18 = vadd.f32 %v2478_v34, %v2234_v9  ;;  %2328 = vmatmul.f32.gmra.mxu1 %v4798_v12  ;;  %v4806_v9 = vld [vmem:[#allocation34_spill] sm:$0xff] }
 0x2e0   :  { %2706 = vmatmul.f32.gmra.mxu3 %v4799_v13  ;;  %v4807_v34 = vld [vmem:[#allocation38_spill] sm:$0xff] }
 0x2e1   :  { %v2640_v8 = vadd.f32 %v2639_v48, %v2479_v18  ;;  %2545 = vmatmul.f32.gmra.mxu2 %v4799_v13 }
 0x2e3   :  { %2922 = vst [vmem:[#allocation8 + $0x28] sm:$0xff] %v2640_v8  ;;  %v2044_v37 = vpop.f32.mrf.mxu0 }
 0x2e4   :  { %v2239_v25 = vpop.f32.mrf.mxu1  ;;  %v2482_v52 = vpop.f32.mrf.mxu2  ;;  %v2045_v60 = vadd.f32 %v2044_v37, %v4095_v0 }
 0x2e5   :  { %v2240_v28 = vadd.f32 %v2239_v25, %v2040_v51  ;;  %v2643_v49 = vpop.f32.mrf.mxu3  ;;  %v4809_v51 = vand.u32 4294901760, %v4804_v11  ;;  %v4810_v25 = vld [vmem:[#allocation35_spill] sm:$0xff] }
 0x2e6   :  { %2123 = vmatmul.f32.gmra.mxu0 %v4801_v47 }
 0x2e7   :  { %v2483_v43 = vadd.f32 %v2482_v52, %v2240_v28  ;;  %2334 = vmatmul.f32.gmra.mxu1 %v4802_v54 }
 0x2e8   :  { %2710 = vmatmul.f32.gmra.mxu3 %v4803_v27 }
 0x2e9   :  { %v2644_v10 = vadd.f32 %v2643_v49, %v2483_v43  ;;  %2549 = vmatmul.f32.gmra.mxu2 %v4803_v27  ;;  %v4811_v27 = vand.u32 4294901760, %v4808_v14 }
 0x2eb   :  { %2923 = vst [vmem:[#allocation8 + $0x30] sm:$0xff] %v2644_v10  ;;  %v2049_v41 = vpop.f32.mrf.mxu0 }
 0x2ec   :  { %v2245_v1 = vpop.f32.mrf.mxu1  ;;  %v2486_v61 = vpop.f32.mrf.mxu2  ;;  %v2050_v48 = vadd.f32 %v2049_v41, %v4807_v34  ;;  %v4812_v41 = vld [vmem:[#allocation37_spill] sm:$0xff] }
 0x2ed   :  { %v2246_v62 = vadd.f32 %v2245_v1, %v2045_v60  ;;  %v2647_v32 = vpop.f32.mrf.mxu3 }
 0x2ee   :  { %2128 = vmatmul.f32.gmra.mxu0 %v4804_v11 }
 0x2ef   :  { %v2487_v57 = vadd.f32 %v2486_v61, %v2246_v62  ;;  %2340 = vmatmul.f32.gmra.mxu1 %v4805_v29  ;;  %v4813_v29 = vand.u32 4294901760, %v4102_v19 }
 0x2f0   :  { %2714 = vmatmul.f32.gmra.mxu3 %v4806_v9 }
 0x2f1   :  { %v2648_v17 = vadd.f32 %v2647_v32, %v2487_v57  ;;  %2553 = vmatmul.f32.gmra.mxu2 %v4806_v9  ;;  %v4814_v9 = vld [vmem:[#allocation33_spill] sm:$0xff] }
 0x2f3   :  { %2924 = vst [vmem:[#allocation8 + $0x38] sm:$0xff] %v2648_v17  ;;  %v2054_v0 = vpop.f32.mrf.mxu0 }
 0x2f4   :  { %v2251_v18 = vpop.f32.mrf.mxu1  ;;  %v2490_v12 = vpop.f32.mrf.mxu2  ;;  %v2055_v28 = vadd.f32 %v2054_v0, %v4125_v24 }
 0x2f5   :  { %v2252_v4 = vadd.f32 %v2251_v18, %v2050_v48  ;;  %v2651_v8 = vpop.f32.mrf.mxu3 }
 0x2f6   :  { %2133 = vmatmul.f32.gmra.mxu0 %v4808_v14 }
 0x2f7   :  { %v2491_v13 = vadd.f32 %v2490_v12, %v2252_v4  ;;  %2346 = vmatmul.f32.gmra.mxu1 %v4809_v51 }
 0x2f8   :  { %2718 = vmatmul.f32.gmra.mxu3 %v4810_v25 }
 0x2f9   :  { %v2652_v37 = vadd.f32 %v2651_v8, %v2491_v13  ;;  %2557 = vmatmul.f32.gmra.mxu2 %v4810_v25  ;;  %v4815_v8 = vand.u32 4294901760, %v4117_v15  ;;  %v4816_v13 = vld [vmem:[#allocation39_spill] sm:$0xff] }
 0x2fb   :  { %2925 = vst [vmem:[#allocation8 + $0x40] sm:$0xff] %v2652_v37  ;;  %v2059_v52 = vpop.f32.mrf.mxu0 }
 0x2fc   :  { %v2257_v49 = vpop.f32.mrf.mxu1  ;;  %v2494_v47 = vpop.f32.mrf.mxu2  ;;  %v2060_v1 = vadd.f32 %v2059_v52, %v4140_v5 }
 0x2fd   :  { %v2258_v43 = vadd.f32 %v2257_v49, %v2055_v28  ;;  %v2655_v54 = vpop.f32.mrf.mxu3  ;;  %v4817_v49 = vand.u32 4294901760, %v4132_v6 }
 0x2fe   :  { %2138 = vmatmul.f32.gmra.mxu0 %v4102_v19 }
 0x2ff   :  { %v2495_v10 = vadd.f32 %v2494_v47, %v2258_v43  ;;  %2352 = vmatmul.f32.gmra.mxu1 %v4811_v27 }
 0x300   :  { %2722 = vmatmul.f32.gmra.mxu3 %v4812_v41 }
 0x301   :  { %v2656_v60 = vadd.f32 %v2655_v54, %v2495_v10  ;;  %2561 = vmatmul.f32.gmra.mxu2 %v4812_v41  ;;  %v4818_v41 = vand.u32 4294901760, %v4147_v42 }
 0x303   :  { %2926 = vst [vmem:[#allocation8 + $0x48] sm:$0xff] %v2656_v60  ;;  %v2064_v24 = vpop.f32.mrf.mxu0 }
 0x304   :  { %v2263_v62 = vpop.f32.mrf.mxu1  ;;  %v2498_v32 = vpop.f32.mrf.mxu2  ;;  %v2065_v34 = vadd.f32 %v2064_v24, %v4155_v20 }
 0x305   :  { %v2264_v61 = vadd.f32 %v2263_v62, %v2060_v1  ;;  %v2659_v57 = vpop.f32.mrf.mxu3 }
 0x306   :  { %2143 = vmatmul.f32.gmra.mxu0 %v4117_v15 }
 0x307   :  { %v2499_v11 = vadd.f32 %v2498_v32, %v2264_v61  ;;  %2358 = vmatmul.f32.gmra.mxu1 %v4813_v29 }
 0x308   :  { %2726 = vmatmul.f32.gmra.mxu3 %v4814_v9 }
 0x309   :  { %v2660_v17 = vadd.f32 %v2659_v57, %v2499_v11  ;;  %2565 = vmatmul.f32.gmra.mxu2 %v4814_v9  ;;  %v4819_v57 = vand.u32 4294901760, %v4162_v16 }
 0x30b   :  { %2927 = vst [vmem:[#allocation8 + $0x50] sm:$0xff] %v2660_v17  ;;  %v2069_v5 = vpop.f32.mrf.mxu0 }
 0x30c   :  { %v2269_v48 = vpop.f32.mrf.mxu1  ;;  %v2502_v18 = vpop.f32.mrf.mxu2  ;;  %v2070_v14 = vadd.f32 %v2069_v5, %v4170_v59 }
 0x30d   :  { %v2270_v0 = vadd.f32 %v2269_v48, %v2065_v34  ;;  %v2663_v4 = vpop.f32.mrf.mxu3 }
 0x30e   :  { %2148 = vmatmul.f32.gmra.mxu0 %v4132_v6 }
 0x30f   :  { %v2503_v12 = vadd.f32 %v2502_v18, %v2270_v0  ;;  %2364 = vmatmul.f32.gmra.mxu1 %v4815_v8 }
 0x310   :  { %2730 = vmatmul.f32.gmra.mxu3 %v4816_v13 }
 0x311   :  { %v2664_v19 = vadd.f32 %v2663_v4, %v2503_v12  ;;  %2569 = vmatmul.f32.gmra.mxu2 %v4816_v13 }
 0x313   :  { %2928 = vst [vmem:[#allocation8 + $0x58] sm:$0xff] %v2664_v19  ;;  %v2074_v20 = vpop.f32.mrf.mxu0 }
 0x314   :  { %v2275_v51 = vpop.f32.mrf.mxu1  ;;  %v2506_v25 = vpop.f32.mrf.mxu2  ;;  %v2075_v43 = vadd.f32 %v2074_v20, %v4183_v50 }
 0x315   :  { %v2276_v37 = vadd.f32 %v2275_v51, %v2070_v14  ;;  %v2667_v28 = vpop.f32.mrf.mxu3 }
 0x316   :  { %2153 = vmatmul.f32.gmra.mxu0 %v4147_v42 }
 0x317   :  { %v2507_v52 = vadd.f32 %v2506_v25, %v2276_v37  ;;  %2370 = vmatmul.f32.gmra.mxu1 %v4817_v49 }
 0x318   :  { %2734 = vmatmul.f32.gmra.mxu3 %v4136_v3 }
 0x319   :  { %v2668_v15 = vadd.f32 %v2667_v28, %v2507_v52  ;;  %2573 = vmatmul.f32.gmra.mxu2 %v4136_v3 }
 0x31b   :  { %2929 = vst [vmem:[#allocation8 + $0x60] sm:$0xff] %v2668_v15  ;;  %v2079_v59 = vpop.f32.mrf.mxu0 }
 0x31c   :  { %v2281_v47 = vpop.f32.mrf.mxu1  ;;  %v2510_v10 = vpop.f32.mrf.mxu2  ;;  %v2080_v3 = vadd.f32 %v2079_v59, %v4192_v44 }
 0x31d   :  { %v2282_v54 = vadd.f32 %v2281_v47, %v2075_v43  ;;  %v2671_v27 = vpop.f32.mrf.mxu3 }
 0x31e   :  { %2158 = vmatmul.f32.gmra.mxu0 %v4162_v16 }
 0x31f   :  { %v2511_v60 = vadd.f32 %v2510_v10, %v2282_v54  ;;  %2376 = vmatmul.f32.gmra.mxu1 %v4818_v41 }
 0x320   :  { %2738 = vmatmul.f32.gmra.mxu3 %v4151_v53 }
 0x321   :  { %v2672_v6 = vadd.f32 %v2671_v27, %v2511_v60  ;;  %2577 = vmatmul.f32.gmra.mxu2 %v4151_v53 }
 0x323   :  { %2930 = vst [vmem:[#allocation8 + $0x68] sm:$0xff] %v2672_v6  ;;  %v2084_v50 = vpop.f32.mrf.mxu0 }
 0x324   :  { %v2287_v1 = vpop.f32.mrf.mxu1  ;;  %v2514_v62 = vpop.f32.mrf.mxu2  ;;  %v2085_v53 = vadd.f32 %v2084_v50, %v4198_v7 }
 0x325   :  { %v2288_v24 = vadd.f32 %v2287_v1, %v2080_v3  ;;  %v2675_v61 = vpop.f32.mrf.mxu3 }
 0x326   :  { %2163 = vmatmul.f32.gmra.mxu0 %v4177_v30 }
 0x327   :  { %v2515_v32 = vadd.f32 %v2514_v62, %v2288_v24  ;;  %2382 = vmatmul.f32.gmra.mxu1 %v4819_v57 }
 0x328   :  { %2742 = vmatmul.f32.gmra.mxu3 %v4166_v23 }
 0x329   :  { %v2676_v42 = vadd.f32 %v2675_v61, %v2515_v32  ;;  %2581 = vmatmul.f32.gmra.mxu2 %v4166_v23 }
 0x32b   :  { %2931 = vst [vmem:[#allocation8 + $0x70] sm:$0xff] %v2676_v42  ;;  %v2089_v44 = vpop.f32.mrf.mxu0 }
 0x32c   :  { %v2293_v11 = vpop.f32.mrf.mxu1  ;;  %v2518_v17 = vpop.f32.mrf.mxu2  ;;  %v2090_v16 = vadd.f32 %v2089_v44, %v4206_v63 }
 0x32d   :  { %v2294_v29 = vadd.f32 %v2293_v11, %v2085_v53  ;;  %v2679_v9 = vpop.f32.mrf.mxu3 }
 0x32f   :  { %v2519_v34 = vadd.f32 %v2518_v17, %v2294_v29  ;;  %2388 = vmatmul.f32.gmra.mxu1 %v1726_v45 }
 0x331   :  { %v2680_v5 = vadd.f32 %v2679_v9, %v2519_v34 }
 0x333   :  { %2932 = vst [vmem:[#allocation8 + $0x78] sm:$0xff] %v2680_v5  ;;  %v2094_v48 = vpop.f32.mrf.mxu0 }
 0x334   :  { %v2299_v0 = vpop.f32.mrf.mxu1  ;;  %v2522_v23 = vpop.f32.mrf.mxu2  ;;  %v2095_v8 = vadd.f32 %v2094_v48, %v4214_v36 }
 0x335   :  { %v2300_v18 = vadd.f32 %v2299_v0, %v2090_v16  ;;  %v2683_v4 = vpop.f32.mrf.mxu3 }
 0x337   :  { %v2523_v7 = vadd.f32 %v2522_v23, %v2300_v18 }
 0x339   :  { %v2684_v12 = vadd.f32 %v2683_v4, %v2523_v7 }
 0x33b   :  { %2933 = vst [vmem:[#allocation8 + $0x80] sm:$0xff] %v2684_v12  ;;  %v2099_v19 = vpop.f32.mrf.mxu0 }
 0x33c   :  { %v2305_v13 = vpop.f32.mrf.mxu1  ;;  %v2526_v20 = vpop.f32.mrf.mxu2  ;;  %v2100_v63 = vadd.f32 %v2099_v19, %v4222_v58 }
 0x33d   :  { %v2306_v14 = vadd.f32 %v2305_v13, %v2095_v8  ;;  %v2687_v30 = vpop.f32.mrf.mxu3 }
 0x33f   :  { %v2527_v45 = vadd.f32 %v2526_v20, %v2306_v14 }
 0x341   :  { %v2688_v51 = vadd.f32 %v2687_v30, %v2527_v45 }
 0x343   :  { %2934 = vst [vmem:[#allocation8 + $0x88] sm:$0xff] %v2688_v51  ;;  %v2104_v37 = vpop.f32.mrf.mxu0 }
 0x344   :  { %v2311_v25 = vpop.f32.mrf.mxu1  ;;  %v2530_v52 = vpop.f32.mrf.mxu2  ;;  %v2105_v36 = vadd.f32 %v2104_v37, %v4230_v33 }
 0x345   :  { %v2312_v28 = vadd.f32 %v2311_v25, %v2100_v63  ;;  %v2691_v49 = vpop.f32.mrf.mxu3 }
 0x347   :  { %v2531_v15 = vadd.f32 %v2530_v52, %v2312_v28 }
 0x349   :  { %v2692_v43 = vadd.f32 %v2691_v49, %v2531_v15 }
 0x34b   :  { %2935 = vst [vmem:[#allocation8 + $0x90] sm:$0xff] %v2692_v43  ;;  %v2109_v59 = vpop.f32.mrf.mxu0 }
 0x34c   :  { %v2317_v47 = vpop.f32.mrf.mxu1  ;;  %v2534_v10 = vpop.f32.mrf.mxu2  ;;  %v2110_v58 = vadd.f32 %v2109_v59, %v4238_v35 }
 0x34d   :  { %v2318_v54 = vadd.f32 %v2317_v47, %v2105_v36  ;;  %v2695_v27 = vpop.f32.mrf.mxu3 }
 0x34f   :  { %v2535_v60 = vadd.f32 %v2534_v10, %v2318_v54 }
 0x351   :  { %v2696_v41 = vadd.f32 %v2695_v27, %v2535_v60 }
 0x353   :  { %2936 = vst [vmem:[#allocation8 + $0x98] sm:$0xff] %v2696_v41  ;;  %v2114_v6 = vpop.f32.mrf.mxu0 }
 0x354   :  { %v2323_v3 = vpop.f32.mrf.mxu1  ;;  %v2538_v1 = vpop.f32.mrf.mxu2  ;;  %v2115_v33 = vadd.f32 %v2114_v6, %v4246_v55 }
 0x355   :  { %v2324_v50 = vadd.f32 %v2323_v3, %v2110_v58  ;;  %v2699_v24 = vpop.f32.mrf.mxu3 }
 0x357   :  { %v2539_v62 = vadd.f32 %v2538_v1, %v2324_v50 }
 0x359   :  { %v2700_v61 = vadd.f32 %v2699_v24, %v2539_v62 }
 0x35b   :  { %2937 = vst [vmem:[#allocation8 + $0xa0] sm:$0xff] %v2700_v61  ;;  %v2119_v32 = vpop.f32.mrf.mxu0 }
 0x35c   :  { %v2329_v57 = vpop.f32.mrf.mxu1  ;;  %v2542_v53 = vpop.f32.mrf.mxu2  ;;  %v2120_v35 = vadd.f32 %v2119_v32, %v4254_v40 }
 0x35d   :  { %v2330_v42 = vadd.f32 %v2329_v57, %v2115_v33  ;;  %v2703_v44 = vpop.f32.mrf.mxu3 }
 0x35f   :  { %v2543_v11 = vadd.f32 %v2542_v53, %v2330_v42 }
 0x361   :  { %v2704_v29 = vadd.f32 %v2703_v44, %v2543_v11 }
 0x363   :  { %2938 = vst [vmem:[#allocation8 + $0xa8] sm:$0xff] %v2704_v29  ;;  %v2124_v17 = vpop.f32.mrf.mxu0 }
 0x364   :  { %v2335_v9 = vpop.f32.mrf.mxu1  ;;  %v2546_v5 = vpop.f32.mrf.mxu2  ;;  %v2125_v55 = vadd.f32 %v2124_v17, %v4262_v2 }
 0x365   :  { %v2336_v34 = vadd.f32 %v2335_v9, %v2120_v35  ;;  %v2707_v16 = vpop.f32.mrf.mxu3 }
 0x367   :  { %v2547_v48 = vadd.f32 %v2546_v5, %v2336_v34 }
 0x369   :  { %v2708_v0 = vadd.f32 %v2707_v16, %v2547_v48 }
 0x36b   :  { %2939 = vst [vmem:[#allocation8 + $0xb0] sm:$0xff] %v2708_v0  ;;  %v2129_v18 = vpop.f32.mrf.mxu0 }
 0x36c   :  { %v2341_v23 = vpop.f32.mrf.mxu1  ;;  %v2550_v7 = vpop.f32.mrf.mxu2  ;;  %v2130_v40 = vadd.f32 %v2129_v18, %v4270_v22 }
 0x36d   :  { %v2342_v4 = vadd.f32 %v2341_v23, %v2125_v55  ;;  %v2711_v12 = vpop.f32.mrf.mxu3 }
 0x36f   :  { %v2551_v8 = vadd.f32 %v2550_v7, %v2342_v4 }
 0x371   :  { %v2712_v19 = vadd.f32 %v2711_v12, %v2551_v8 }
 0x373   :  { %2940 = vst [vmem:[#allocation8 + $0xb8] sm:$0xff] %v2712_v19  ;;  %v2134_v13 = vpop.f32.mrf.mxu0 }
 0x374   :  { %v2347_v14 = vpop.f32.mrf.mxu1  ;;  %v2554_v30 = vpop.f32.mrf.mxu2  ;;  %v2135_v2 = vadd.f32 %v2134_v13, %v4278_v31 }
 0x375   :  { %v2348_v20 = vadd.f32 %v2347_v14, %v2130_v40  ;;  %v2715_v45 = vpop.f32.mrf.mxu3 }
 0x377   :  { %v2555_v51 = vadd.f32 %v2554_v30, %v2348_v20 }
 0x379   :  { %v2716_v63 = vadd.f32 %v2715_v45, %v2555_v51 }
 0x37b   :  { %2941 = vst [vmem:[#allocation8 + $0xc0] sm:$0xff] %v2716_v63  ;;  %v2139_v37 = vpop.f32.mrf.mxu0 }
 0x37c   :  { %v2353_v25 = vpop.f32.mrf.mxu1  ;;  %v2558_v52 = vpop.f32.mrf.mxu2  ;;  %v2140_v22 = vadd.f32 %v2139_v37, %v4286_v21 }
 0x37d   :  { %v2354_v28 = vadd.f32 %v2353_v25, %v2135_v2  ;;  %v2719_v49 = vpop.f32.mrf.mxu3 }
 0x37f   :  { %v2559_v15 = vadd.f32 %v2558_v52, %v2354_v28 }
 0x381   :  { %v2720_v43 = vadd.f32 %v2719_v49, %v2559_v15 }
 0x383   :  { %2942 = vst [vmem:[#allocation8 + $0xc8] sm:$0xff] %v2720_v43  ;;  %v2144_v36 = vpop.f32.mrf.mxu0 }
 0x384   :  { %v2359_v59 = vpop.f32.mrf.mxu1  ;;  %v2562_v54 = vpop.f32.mrf.mxu2  ;;  %v2145_v31 = vadd.f32 %v2144_v36, %v4294_v26 }
 0x385   :  { %v2360_v47 = vadd.f32 %v2359_v59, %v2140_v22  ;;  %v2723_v10 = vpop.f32.mrf.mxu3 }
 0x387   :  { %v2563_v27 = vadd.f32 %v2562_v54, %v2360_v47 }
 0x389   :  { %v2724_v60 = vadd.f32 %v2723_v10, %v2563_v27 }
 0x38b   :  { %2943 = vst [vmem:[#allocation8 + $0xd0] sm:$0xff] %v2724_v60  ;;  %v2149_v41 = vpop.f32.mrf.mxu0 }
 0x38c   :  { %v2365_v58 = vpop.f32.mrf.mxu1  ;;  %v2566_v3 = vpop.f32.mrf.mxu2  ;;  %v2150_v21 = vadd.f32 %v2149_v41, %v4302_v56 }
 0x38d   :  { %v2366_v6 = vadd.f32 %v2365_v58, %v2145_v31  ;;  %v2727_v50 = vpop.f32.mrf.mxu3 }
 0x38f   :  { %v2567_v1 = vadd.f32 %v2566_v3, %v2366_v6 }
 0x391   :  { %v2728_v24 = vadd.f32 %v2727_v50, %v2567_v1 }
 0x393   :  { %2944 = vst [vmem:[#allocation8 + $0xd8] sm:$0xff] %v2728_v24  ;;  %v2154_v62 = vpop.f32.mrf.mxu0 }
 0x394   :  { %v2371_v61 = vpop.f32.mrf.mxu1  ;;  %v2570_v32 = vpop.f32.mrf.mxu2  ;;  %v2155_v26 = vadd.f32 %v2154_v62, %v4310_v46 }
 0x395   :  { %v2372_v33 = vadd.f32 %v2371_v61, %v2150_v21  ;;  %v2731_v57 = vpop.f32.mrf.mxu3 }
 0x397   :  { %v2571_v42 = vadd.f32 %v2570_v32, %v2372_v33 }
 0x399   :  { %v2732_v53 = vadd.f32 %v2731_v57, %v2571_v42 }
 0x39b   :  { %2945 = vst [vmem:[#allocation8 + $0xe0] sm:$0xff] %v2732_v53  ;;  %v2159_v17 = vpop.f32.mrf.mxu0 }
 0x39c   :  { %v2377_v44 = vpop.f32.mrf.mxu1  ;;  %v2574_v29 = vpop.f32.mrf.mxu2  ;;  %v2160_v56 = vadd.f32 %v2159_v17, %v4318_v38 }
 0x39d   :  { %v2378_v11 = vadd.f32 %v2377_v44, %v2155_v26  ;;  %v2735_v35 = vpop.f32.mrf.mxu3 }
 0x39f   :  { %v2575_v9 = vadd.f32 %v2574_v29, %v2378_v11 }
 0x3a1   :  { %v2736_v34 = vadd.f32 %v2735_v35, %v2575_v9 }
 0x3a3   :  { %2946 = vst [vmem:[#allocation8 + $0xe8] sm:$0xff] %v2736_v34  ;;  %v2164_v18 = vpop.f32.mrf.mxu0 }
 0x3a4   :  { %v2383_v5 = vpop.f32.mrf.mxu1  ;;  %v2578_v48 = vpop.f32.mrf.mxu2  ;;  %v2165_v46 = vadd.f32 %v2164_v18, %v4326_v39 }
 0x3a5   :  { %v2384_v16 = vadd.f32 %v2383_v5, %v2160_v56  ;;  %v2739_v0 = vpop.f32.mrf.mxu3 }
 0x3a7   :  { %v2579_v55 = vadd.f32 %v2578_v48, %v2384_v16 }
 0x3a9   :  { %v2740_v23 = vadd.f32 %v2739_v0, %v2579_v55 }
 0x3ab   :  { %2947 = vst [vmem:[#allocation8 + $0xf0] sm:$0xff] %v2740_v23 }
 0x3ac   :  { %v2389_v4 = vpop.f32.mrf.mxu1  ;;  %v2582_v12 = vpop.f32.mrf.mxu2 }
 0x3ad   :  { %v2390_v7 = vadd.f32 %v2389_v4, %v2165_v46  ;;  %v2743_v8 = vpop.f32.mrf.mxu3 }
 0x3af   :  { %v2583_v38 = vadd.f32 %v2582_v12, %v2390_v7 }
 0x3b1   :  { %v2744_v19 = vadd.f32 %v2743_v8, %v2583_v38 }
 0x3b3   :  { %2948 = vst [vmem:[#allocation8 + $0xf8] sm:$0xff] %v2744_v19 }
 0x3b4   :  { %2961 = dma.vmem_to_hbm [thread:$0]  %s2954_s1, 4096, %s2956_s25, [#allocation5], %s3058_s21, %s3058_s21, %s3059_s22  }
 0x3b5   :  { %3052 = dma.done.wait [#allocation5], 4096  }
 0x3b6   :  { %3053 = vsyncadd [#allocation5], 4294963200 }
 0x3b7   :  { %2966 = vsyncpa [#allocation4], 1 }
 0x3b8   :  { %2967 = vsyncpa [#allocation7], 1 }
 0x3b9   :  { %2968 = vsyncpa [#allocation5], 1 }

</bundles_post_ra>
